<compile_context>
chip_gen: v7x
topology: tpu7x:2x2x1
jax: 0.10.0
libtpu: 0.0.40
codegen_flags: <defaults>
</compile_context>

<pallas_src>
import functools

import jax
import jax.numpy as jnp
import numpy as np
from jax.experimental import pallas as pl
from jax.experimental.pallas import tpu as pltpu

LANE = 128
SUB = 8
STRIP = 8            # sublane-rows processed per inner-loop iteration (1 vreg)
MAX_TB = 256         # sublane-rows per grid step -> up to 32768 boxes / step
EPS = 1e-7


# ----------------------------- kernel helpers ------------------------------
def _load(ref, c, off):
    """Load component c of a (9, TB, 128) ref as a (STRIP, 128) f32 slab."""
    return ref[c, pl.ds(off, STRIP), :].astype(jnp.float32)


def _rot_zxy_rows(e0, e1, e2):
    """R = Rz(e0) @ Rx(e1) @ Ry(e2); each entry is a (STRIP, 128) slab."""
    cz, sz = jnp.cos(e0), jnp.sin(e0)
    cx, sx = jnp.cos(e1), jnp.sin(e1)
    cy, sy = jnp.cos(e2), jnp.sin(e2)
    sxsy = sx * sy           # hoisted shared trig products
    sxcy = sx * cy
    r00 = cz * cy - sz * sxsy
    r01 = -sz * cx
    r02 = cz * sy + sz * sxcy
    r10 = sz * cy + cz * sxsy
    r11 = cz * cx
    r12 = sz * sy - cz * sxcy
    r20 = -cx * sy
    r21 = sx
    r22 = cx * cy
    return ((r00, r01, r02), (r10, r11, r12), (r20, r21, r22))


def _sigma_unique(ref, off, decode_sizes):
    """Unique entries of Sigma = R diag(size/2) R^T for one (STRIP,128) strip.

    Returns (diag[3], offdiag[3]) lists of (STRIP, 128) slabs (Sigma symmetric).
    """
    s0 = _load(ref, 3, off)
    s1 = _load(ref, 4, off)
    s2 = _load(ref, 5, off)
    if decode_sizes:
        s0, s1, s2 = jnp.exp(s0), jnp.exp(s1), jnp.exp(s2)
    d0, d1, d2 = s0 * 0.5, s1 * 0.5, s2 * 0.5

    e0 = _load(ref, 6, off)
    e1 = _load(ref, 7, off)
    e2 = _load(ref, 8, off)
    R = _rot_zxy_rows(e0, e1, e2)

    def entry(i, j):
        return (R[i][0] * d0 * R[j][0]
                + R[i][1] * d1 * R[j][1]
                + R[i][2] * d2 * R[j][2])

    diag = [entry(0, 0), entry(1, 1), entry(2, 2)]
    offd = [entry(0, 1), entry(0, 2), entry(1, 2)]
    return diag, offd


# --------------------------------- kernel -----------------------------------
def dof9_box_loss_kernel(box_ref, tgt_ref, out_ref, *,
                         n, w_wd, w_cd, decode_pred):
    # box_ref / tgt_ref: (9, TB, 128); out_ref: (TB, 1) per-row loss sums.
    tb = out_ref.shape[0]
    n_strips = tb // STRIP
    row0 = pl.program_id(0) * tb
    # constant (STRIP, 128) local box-index pattern: r * 128 + lane
    local_idx = (jax.lax.broadcasted_iota(jnp.int32, (STRIP, LANE), 0) * LANE
                 + jax.lax.broadcasted_iota(jnp.int32, (STRIP, LANE), 1))

    def strip(off):
        # center distance^2
        bx = _load(box_ref, 0, off)
        by = _load(box_ref, 1, off)
        bz = _load(box_ref, 2, off)
        tx = _load(tgt_ref, 0, off)
        ty = _load(tgt_ref, 1, off)
        tz = _load(tgt_ref, 2, off)
        dcx = bx - tx
        dcy = by - ty
        dcz = bz - tz
        dc2 = (dcx * dcx + dcy * dcy) + dcz * dcz        # (STRIP, 128)

        loss = jnp.zeros_like(dc2)

        if w_wd > 0.0:
            s1d, s1o = _sigma_unique(box_ref, off, decode_pred)
            s2d, s2o = _sigma_unique(tgt_ref, off, False)
            dd = [(a - c) * (a - c) for a, c in zip(s1d, s2d)]
            do = [(a - c) * (a - c) for a, c in zip(s1o, s2o)]
            # tree sums; symmetry -> 2x off-diagonal
            sig2 = ((dd[0] + dd[1]) + dd[2]) + 2.0 * ((do[0] + do[1]) + do[2])
            m = jnp.maximum(dc2 + sig2, EPS)
            loss = loss + w_wd * (m * jax.lax.rsqrt(m))   # sqrt via EUP rsqrt

        if w_cd > 0.0:
            m = jnp.maximum(dc2, EPS)
            loss = loss + w_cd * (m * jax.lax.rsqrt(m))

        # mask out padded boxes, reduce across lanes (XLU) -> (STRIP, 1)
        idx = (row0 + off) * LANE + local_idx
        loss = jnp.where(idx < n, loss, 0.0)
        out_ref[pl.ds(off, STRIP), :] = jnp.sum(loss, axis=-1, keepdims=True)

    if n_strips == 1:
        strip(0)
    else:
        def body(s, carry):
            strip(pl.multiple_of(s * STRIP, STRIP))
            return carry
        jax.lax.fori_loop(0, n_strips, body, 0)


# ------------------------------ tiling helper --------------------------------
def _tile_layout(n):
    """Pad n boxes to (k sublane-rows x 128 lanes) and pick rows-per-step.

    k is a multiple of 8.  tb is the largest multiple-of-8 divisor of k that
    is <= MAX_TB, with grid >= 2 whenever k >= 16 (v7x megacore sharding).
    No extra padding beyond the 1024-box chunk is ever introduced.
    """
    chunk = SUB * LANE                         # 1024 boxes
    n_pad = ((n + chunk - 1) // chunk) * chunk
    k = n_pad // LANE                          # multiple of 8
    m = k // SUB
    max_d = MAX_TB // SUB
    best = 1
    for d in range(1, m + 1):
        if d > max_d:
            break
        if m % d:
            continue
        if m >= 2 and m // d < 2:              # keep >= 2 grid steps
            continue
        best = d
    tb = SUB * best
    return n_pad, k, tb


# --------------------------------- module -----------------------------------
class DoF9BoxLoss:
    def __init__(self, loss_weight_wd=1.0, loss_weight_pcd=0.0,
                 loss_weight_cd=0.8, decode_pred=False):
        self.loss_weight_wd = float(loss_weight_wd)
        self.loss_weight_pcd = float(loss_weight_pcd)
        self.loss_weight_cd = float(loss_weight_cd)
        self.decode_pred = bool(decode_pred)
        if self.loss_weight_pcd > 0:
            # TODO(synk): permutation_corner_distance has no reconstruction here.
            raise NotImplementedError("permutation_corner_distance not implemented")

    def __call__(self, box, box_target, weight=None, avg_factor=None,
                 prefix="", suffix="", **kwargs):
        # NOTE: `weight` is accepted but unused, exactly like the reference
        # forward (it never reads it).
        if box_target.shape[0] == 0:
            loss = jnp.sum(box) * 0
            return {f"{prefix}loss_box{suffix}": loss}

        n = box.shape[0]
        n_pad, k, tb = _tile_layout(n)
        pad = n_pad - n

        def to_slab(x):
            # keep input dtype (bf16 inputs halve HBM traffic; kernel casts to
            # f32).  TODO(synk): for very large N, emit boxes component-major
            # upstream to avoid this pad+transpose round trip.
            x = jnp.pad(x, ((0, pad), (0, 0)))
            return x.T.reshape(9, k, LANE)

        box_t = to_slab(box)
        tgt_t = to_slab(box_target)

        kernel = functools.partial(
            dof9_box_loss_kernel,
            n=n,
            w_wd=self.loss_weight_wd,
            w_cd=self.loss_weight_cd,
            decode_pred=self.decode_pred,
        )

        bytes_in = 9 * n_pad * (np.dtype(box.dtype).itemsize
                                + np.dtype(box_target.dtype).itemsize)
        cost = pl.CostEstimate(flops=200 * n_pad,
                               transcendentals=14 * n_pad,
                               bytes_accessed=bytes_in + 4 * k)

        row_sums = pl.pallas_call(
            kernel,
            out_shape=jax.ShapeDtypeStruct((k, 1), jnp.float32),
            grid=(k // tb,),
            in_specs=[
                pl.BlockSpec((9, tb, LANE), lambda i: (0, i, 0)),
                pl.BlockSpec((9, tb, LANE), lambda i: (0, i, 0)),
            ],
            out_specs=pl.BlockSpec((tb, 1), lambda i: (i, 0)),
            compiler_params=pltpu.CompilerParams(
                dimension_semantics=("parallel",)),
            cost_estimate=cost,
        )(box_t, tgt_t)

        total = jnp.sum(row_sums)
        if avg_factor is None:
            loss = total / n
        else:
            loss = total / avg_factor
        return {f"{prefix}loss_box{suffix}": loss}


# ----------------------------- pure-JAX reference ----------------------------
def _ref_rot_zxy(e):
    cz, sz = jnp.cos(e[..., 0]), jnp.sin(e[..., 0])
    cx, sx = jnp.cos(e[..., 1]), jnp.sin(e[..., 1])
    cy, sy = jnp.cos(e[..., 2]), jnp.sin(e[..., 2])
    R = jnp.stack([
        jnp.stack([cz * cy - sz * sx * sy, -sz * cx, cz * sy + sz * sx * cy], -1),
        jnp.stack([sz * cy + cz * sx * sy, cz * cx, sz * sy - cz * sx * cy], -1),
        jnp.stack([-cx * sy, sx, cx * cy], -1),
    ], -2)
    return R


def _ref_loss(box, tgt, w_wd, w_cd, decode_pred):
    box = box.astype(jnp.float32)
    tgt = tgt.astype(jnp.float32)
    dc2 = jnp.sum((box[..., :3] - tgt[..., :3]) ** 2, -1)

    def sigma(x, decode):
        s = x[..., 3:6]
        if decode:
            s = jnp.exp(s)
        R = _ref_rot_zxy(x[..., 6:9])
        D = jax.vmap(jnp.diag)(s * 0.5)
        return R @ D @ jnp.swapaxes(R, -1, -2)

    loss = jnp.zeros_like(dc2)
    if w_wd > 0:
        s1, s2 = sigma(box, decode_pred), sigma(tgt, False)
        sig2 = jnp.sum((s1 - s2) ** 2, axis=(-1, -2))
        loss = loss + w_wd * jnp.sqrt(jnp.maximum(dc2 + sig2, EPS))
    if w_cd > 0:
        loss = loss + w_cd * jnp.sqrt(jnp.maximum(dc2, EPS))
    return loss.mean()


# ----------------------------------- main ------------------------------------
if __name__ == "__main__":
    key = jax.random.PRNGKey(0)

    def make_boxes(k_, n):
        k1, k2, k3, k4 = jax.random.split(k_, 4)
        centers = jax.random.normal(k1, (n, 3), jnp.float32)
        sizes = jax.random.uniform(k2, (n, 3), jnp.float32, 0.3, 2.0)
        angles = jax.random.uniform(k3, (n, 3), jnp.float32, -np.pi, np.pi)
        box = jnp.concatenate([centers, sizes, angles], axis=-1)
        tgt = box + 0.1 * jax.random.normal(k4, (n, 9), jnp.float32)
        return box, tgt

    module = DoF9BoxLoss(loss_weight_wd=1.0, loss_weight_pcd=0.0,
                         loss_weight_cd=0.8, decode_pred=False)

    # n=8     -> single grid step, single strip (small-shape path)
    # n=9000  -> k=72, tb=24, grid=3 (no round-up padding), fori strip loop
    # n=16384 -> k=128, tb=64, grid=2 (megacore split), 8-strip fori loop
    for n in (8, 9000, 16384):
        box, box_target = make_boxes(jax.random.fold_in(key, n), n)
        out = module(box, box_target)
        loss = jax.block_until_ready(out["loss_box"])
        ref = jax.block_until_ready(_ref_loss(box, box_target, 1.0, 0.8, False))
        if not np.allclose(np.asarray(loss), np.asarray(ref), rtol=1e-3, atol=1e-3):
            raise AssertionError(f"n={n}: kernel {loss} vs ref {ref}")

    print("KERNEL_OK")
</pallas_src>

<mosaic_0001>
module attributes {stable_mosaic.version = 11 : i64} {
  func.func @dof9_box_loss_kernel(%arg0: i32, %arg1: memref<9x8x128xf32, #tpu.memory_space<vmem>>, %arg2: memref<9x8x128xf32, #tpu.memory_space<vmem>>, %arg3: memref<8x1xf32, #tpu.memory_space<vmem>>) attributes {dimension_semantics = [#tpu.dimension_semantics<parallel>], iteration_bounds = array<i64: 1>, scalar_prefetch = 0 : i64, scratch_operands = 0 : i64, tpu.core_type = #tpu.core_type<tc>, window_params = [{transform_indices = @transform_0, window_bounds = array<i64: 9, 8, 128>}, {transform_indices = @transform_1, window_bounds = array<i64: 9, 8, 128>}, {transform_indices = @transform_2, window_bounds = array<i64: 8, 1>}]} {
    %c8_i32 = arith.constant 8 : i32
    %0 = arith.muli %arg0, %c8_i32 : i32
    %1 = tpu.iota {dimensions = array<i32: 0>} : vector<8x128xi32>
    %c128_i32 = arith.constant 128 : i32
    %2 = vector.broadcast %c128_i32 : i32 to vector<8x128xi32>
    %3 = arith.muli %1, %2 : vector<8x128xi32>
    %4 = tpu.iota {dimensions = array<i32: 1>} : vector<8x128xi32>
    %5 = arith.addi %3, %4 : vector<8x128xi32>
    %c0 = arith.constant 0 : index
    %c0_0 = arith.constant 0 : index
    %c0_1 = arith.constant 0 : index
    %6 = vector.load %arg1[%c0, %c0_0, %c0_1] : memref<9x8x128xf32, #tpu.memory_space<vmem>>, vector<1x8x128xf32>
    %7 = vector.shape_cast %6 : vector<1x8x128xf32> to vector<8x128xf32>
    %c1 = arith.constant 1 : index
    %c0_2 = arith.constant 0 : index
    %c0_3 = arith.constant 0 : index
    %8 = vector.load %arg1[%c1, %c0_2, %c0_3] : memref<9x8x128xf32, #tpu.memory_space<vmem>>, vector<1x8x128xf32>
    %9 = vector.shape_cast %8 : vector<1x8x128xf32> to vector<8x128xf32>
    %c2 = arith.constant 2 : index
    %c0_4 = arith.constant 0 : index
    %c0_5 = arith.constant 0 : index
    %10 = vector.load %arg1[%c2, %c0_4, %c0_5] : memref<9x8x128xf32, #tpu.memory_space<vmem>>, vector<1x8x128xf32>
    %11 = vector.shape_cast %10 : vector<1x8x128xf32> to vector<8x128xf32>
    %c0_6 = arith.constant 0 : index
    %c0_7 = arith.constant 0 : index
    %c0_8 = arith.constant 0 : index
    %12 = vector.load %arg2[%c0_6, %c0_7, %c0_8] : memref<9x8x128xf32, #tpu.memory_space<vmem>>, vector<1x8x128xf32>
    %13 = vector.shape_cast %12 : vector<1x8x128xf32> to vector<8x128xf32>
    %c1_9 = arith.constant 1 : index
    %c0_10 = arith.constant 0 : index
    %c0_11 = arith.constant 0 : index
    %14 = vector.load %arg2[%c1_9, %c0_10, %c0_11] : memref<9x8x128xf32, #tpu.memory_space<vmem>>, vector<1x8x128xf32>
    %15 = vector.shape_cast %14 : vector<1x8x128xf32> to vector<8x128xf32>
    %c2_12 = arith.constant 2 : index
    %c0_13 = arith.constant 0 : index
    %c0_14 = arith.constant 0 : index
    %16 = vector.load %arg2[%c2_12, %c0_13, %c0_14] : memref<9x8x128xf32, #tpu.memory_space<vmem>>, vector<1x8x128xf32>
    %17 = vector.shape_cast %16 : vector<1x8x128xf32> to vector<8x128xf32>
    %18 = arith.subf %7, %13 : vector<8x128xf32>
    %19 = arith.subf %9, %15 : vector<8x128xf32>
    %20 = arith.subf %11, %17 : vector<8x128xf32>
    %21 = arith.mulf %18, %18 : vector<8x128xf32>
    %22 = arith.mulf %19, %19 : vector<8x128xf32>
    %23 = arith.addf %21, %22 : vector<8x128xf32>
    %24 = arith.mulf %20, %20 : vector<8x128xf32>
    %25 = arith.addf %23, %24 : vector<8x128xf32>
    %cst = arith.constant 0.000000e+00 : f32
    %26 = vector.broadcast %cst : f32 to vector<8x128xf32>
    %c3 = arith.constant 3 : index
    %c0_15 = arith.constant 0 : index
    %c0_16 = arith.constant 0 : index
    %27 = vector.load %arg1[%c3, %c0_15, %c0_16] : memref<9x8x128xf32, #tpu.memory_space<vmem>>, vector<1x8x128xf32>
    %28 = vector.shape_cast %27 : vector<1x8x128xf32> to vector<8x128xf32>
    %c4 = arith.constant 4 : index
    %c0_17 = arith.constant 0 : index
    %c0_18 = arith.constant 0 : index
    %29 = vector.load %arg1[%c4, %c0_17, %c0_18] : memref<9x8x128xf32, #tpu.memory_space<vmem>>, vector<1x8x128xf32>
    %30 = vector.shape_cast %29 : vector<1x8x128xf32> to vector<8x128xf32>
    %c5 = arith.constant 5 : index
    %c0_19 = arith.constant 0 : index
    %c0_20 = arith.constant 0 : index
    %31 = vector.load %arg1[%c5, %c0_19, %c0_20] : memref<9x8x128xf32, #tpu.memory_space<vmem>>, vector<1x8x128xf32>
    %32 = vector.shape_cast %31 : vector<1x8x128xf32> to vector<8x128xf32>
    %cst_21 = arith.constant 5.000000e-01 : f32
    %33 = vector.broadcast %cst_21 : f32 to vector<8x128xf32>
    %34 = arith.mulf %28, %33 : vector<8x128xf32>
    %cst_22 = arith.constant 5.000000e-01 : f32
    %35 = vector.broadcast %cst_22 : f32 to vector<8x128xf32>
    %36 = arith.mulf %30, %35 : vector<8x128xf32>
    %cst_23 = arith.constant 5.000000e-01 : f32
    %37 = vector.broadcast %cst_23 : f32 to vector<8x128xf32>
    %38 = arith.mulf %32, %37 : vector<8x128xf32>
    %c6 = arith.constant 6 : index
    %c0_24 = arith.constant 0 : index
    %c0_25 = arith.constant 0 : index
    %39 = vector.load %arg1[%c6, %c0_24, %c0_25] : memref<9x8x128xf32, #tpu.memory_space<vmem>>, vector<1x8x128xf32>
    %40 = vector.shape_cast %39 : vector<1x8x128xf32> to vector<8x128xf32>
    %c7 = arith.constant 7 : index
    %c0_26 = arith.constant 0 : index
    %c0_27 = arith.constant 0 : index
    %41 = vector.load %arg1[%c7, %c0_26, %c0_27] : memref<9x8x128xf32, #tpu.memory_space<vmem>>, vector<1x8x128xf32>
    %42 = vector.shape_cast %41 : vector<1x8x128xf32> to vector<8x128xf32>
    %c8 = arith.constant 8 : index
    %c0_28 = arith.constant 0 : index
    %c0_29 = arith.constant 0 : index
    %43 = vector.load %arg1[%c8, %c0_28, %c0_29] : memref<9x8x128xf32, #tpu.memory_space<vmem>>, vector<1x8x128xf32>
    %44 = vector.shape_cast %43 : vector<1x8x128xf32> to vector<8x128xf32>
    %45 = math.cos %40 : vector<8x128xf32>
    %46 = math.sin %40 : vector<8x128xf32>
    %47 = math.cos %42 : vector<8x128xf32>
    %48 = math.sin %42 : vector<8x128xf32>
    %49 = math.cos %44 : vector<8x128xf32>
    %50 = math.sin %44 : vector<8x128xf32>
    %51 = arith.mulf %48, %50 : vector<8x128xf32>
    %52 = arith.mulf %48, %49 : vector<8x128xf32>
    %53 = arith.mulf %45, %49 : vector<8x128xf32>
    %54 = arith.mulf %46, %51 : vector<8x128xf32>
    %55 = arith.subf %53, %54 : vector<8x128xf32>
    %cst_30 = arith.constant 0.000000e+00 : f32
    %56 = vector.broadcast %cst_30 : f32 to vector<8x128xf32>
    %57 = arith.subf %56, %46 : vector<8x128xf32>
    %58 = arith.mulf %57, %47 : vector<8x128xf32>
    %59 = arith.mulf %45, %50 : vector<8x128xf32>
    %60 = arith.mulf %46, %52 : vector<8x128xf32>
    %61 = arith.addf %59, %60 : vector<8x128xf32>
    %62 = arith.mulf %46, %49 : vector<8x128xf32>
    %63 = arith.mulf %45, %51 : vector<8x128xf32>
    %64 = arith.addf %62, %63 : vector<8x128xf32>
    %65 = arith.mulf %45, %47 : vector<8x128xf32>
    %66 = arith.mulf %46, %50 : vector<8x128xf32>
    %67 = arith.mulf %45, %52 : vector<8x128xf32>
    %68 = arith.subf %66, %67 : vector<8x128xf32>
    %cst_31 = arith.constant 0.000000e+00 : f32
    %69 = vector.broadcast %cst_31 : f32 to vector<8x128xf32>
    %70 = arith.subf %69, %47 : vector<8x128xf32>
    %71 = arith.mulf %70, %50 : vector<8x128xf32>
    %72 = arith.mulf %47, %49 : vector<8x128xf32>
    %73 = arith.mulf %55, %34 : vector<8x128xf32>
    %74 = arith.mulf %73, %55 : vector<8x128xf32>
    %75 = arith.mulf %58, %36 : vector<8x128xf32>
    %76 = arith.mulf %75, %58 : vector<8x128xf32>
    %77 = arith.addf %74, %76 : vector<8x128xf32>
    %78 = arith.mulf %61, %38 : vector<8x128xf32>
    %79 = arith.mulf %78, %61 : vector<8x128xf32>
    %80 = arith.addf %77, %79 : vector<8x128xf32>
    %81 = arith.mulf %64, %34 : vector<8x128xf32>
    %82 = arith.mulf %81, %64 : vector<8x128xf32>
    %83 = arith.mulf %65, %36 : vector<8x128xf32>
    %84 = arith.mulf %83, %65 : vector<8x128xf32>
    %85 = arith.addf %82, %84 : vector<8x128xf32>
    %86 = arith.mulf %68, %38 : vector<8x128xf32>
    %87 = arith.mulf %86, %68 : vector<8x128xf32>
    %88 = arith.addf %85, %87 : vector<8x128xf32>
    %89 = arith.mulf %71, %34 : vector<8x128xf32>
    %90 = arith.mulf %89, %71 : vector<8x128xf32>
    %91 = arith.mulf %48, %36 : vector<8x128xf32>
    %92 = arith.mulf %91, %48 : vector<8x128xf32>
    %93 = arith.addf %90, %92 : vector<8x128xf32>
    %94 = arith.mulf %72, %38 : vector<8x128xf32>
    %95 = arith.mulf %94, %72 : vector<8x128xf32>
    %96 = arith.addf %93, %95 : vector<8x128xf32>
    %97 = arith.mulf %55, %34 : vector<8x128xf32>
    %98 = arith.mulf %97, %64 : vector<8x128xf32>
    %99 = arith.mulf %58, %36 : vector<8x128xf32>
    %100 = arith.mulf %99, %65 : vector<8x128xf32>
    %101 = arith.addf %98, %100 : vector<8x128xf32>
    %102 = arith.mulf %61, %38 : vector<8x128xf32>
    %103 = arith.mulf %102, %68 : vector<8x128xf32>
    %104 = arith.addf %101, %103 : vector<8x128xf32>
    %105 = arith.mulf %55, %34 : vector<8x128xf32>
    %106 = arith.mulf %105, %71 : vector<8x128xf32>
    %107 = arith.mulf %58, %36 : vector<8x128xf32>
    %108 = arith.mulf %107, %48 : vector<8x128xf32>
    %109 = arith.addf %106, %108 : vector<8x128xf32>
    %110 = arith.mulf %61, %38 : vector<8x128xf32>
    %111 = arith.mulf %110, %72 : vector<8x128xf32>
    %112 = arith.addf %109, %111 : vector<8x128xf32>
    %113 = arith.mulf %64, %34 : vector<8x128xf32>
    %114 = arith.mulf %113, %71 : vector<8x128xf32>
    %115 = arith.mulf %65, %36 : vector<8x128xf32>
    %116 = arith.mulf %115, %48 : vector<8x128xf32>
    %117 = arith.addf %114, %116 : vector<8x128xf32>
    %118 = arith.mulf %68, %38 : vector<8x128xf32>
    %119 = arith.mulf %118, %72 : vector<8x128xf32>
    %120 = arith.addf %117, %119 : vector<8x128xf32>
    %c3_32 = arith.constant 3 : index
    %c0_33 = arith.constant 0 : index
    %c0_34 = arith.constant 0 : index
    %121 = vector.load %arg2[%c3_32, %c0_33, %c0_34] : memref<9x8x128xf32, #tpu.memory_space<vmem>>, vector<1x8x128xf32>
    %122 = vector.shape_cast %121 : vector<1x8x128xf32> to vector<8x128xf32>
    %c4_35 = arith.constant 4 : index
    %c0_36 = arith.constant 0 : index
    %c0_37 = arith.constant 0 : index
    %123 = vector.load %arg2[%c4_35, %c0_36, %c0_37] : memref<9x8x128xf32, #tpu.memory_space<vmem>>, vector<1x8x128xf32>
    %124 = vector.shape_cast %123 : vector<1x8x128xf32> to vector<8x128xf32>
    %c5_38 = arith.constant 5 : index
    %c0_39 = arith.constant 0 : index
    %c0_40 = arith.constant 0 : index
    %125 = vector.load %arg2[%c5_38, %c0_39, %c0_40] : memref<9x8x128xf32, #tpu.memory_space<vmem>>, vector<1x8x128xf32>
    %126 = vector.shape_cast %125 : vector<1x8x128xf32> to vector<8x128xf32>
    %cst_41 = arith.constant 5.000000e-01 : f32
    %127 = vector.broadcast %cst_41 : f32 to vector<8x128xf32>
    %128 = arith.mulf %122, %127 : vector<8x128xf32>
    %cst_42 = arith.constant 5.000000e-01 : f32
    %129 = vector.broadcast %cst_42 : f32 to vector<8x128xf32>
    %130 = arith.mulf %124, %129 : vector<8x128xf32>
    %cst_43 = arith.constant 5.000000e-01 : f32
    %131 = vector.broadcast %cst_43 : f32 to vector<8x128xf32>
    %132 = arith.mulf %126, %131 : vector<8x128xf32>
    %c6_44 = arith.constant 6 : index
    %c0_45 = arith.constant 0 : index
    %c0_46 = arith.constant 0 : index
    %133 = vector.load %arg2[%c6_44, %c0_45, %c0_46] : memref<9x8x128xf32, #tpu.memory_space<vmem>>, vector<1x8x128xf32>
    %134 = vector.shape_cast %133 : vector<1x8x128xf32> to vector<8x128xf32>
    %c7_47 = arith.constant 7 : index
    %c0_48 = arith.constant 0 : index
    %c0_49 = arith.constant 0 : index
    %135 = vector.load %arg2[%c7_47, %c0_48, %c0_49] : memref<9x8x128xf32, #tpu.memory_space<vmem>>, vector<1x8x128xf32>
    %136 = vector.shape_cast %135 : vector<1x8x128xf32> to vector<8x128xf32>
    %c8_50 = arith.constant 8 : index
    %c0_51 = arith.constant 0 : index
    %c0_52 = arith.constant 0 : index
    %137 = vector.load %arg2[%c8_50, %c0_51, %c0_52] : memref<9x8x128xf32, #tpu.memory_space<vmem>>, vector<1x8x128xf32>
    %138 = vector.shape_cast %137 : vector<1x8x128xf32> to vector<8x128xf32>
    %139 = math.cos %134 : vector<8x128xf32>
    %140 = math.sin %134 : vector<8x128xf32>
    %141 = math.cos %136 : vector<8x128xf32>
    %142 = math.sin %136 : vector<8x128xf32>
    %143 = math.cos %138 : vector<8x128xf32>
    %144 = math.sin %138 : vector<8x128xf32>
    %145 = arith.mulf %142, %144 : vector<8x128xf32>
    %146 = arith.mulf %142, %143 : vector<8x128xf32>
    %147 = arith.mulf %139, %143 : vector<8x128xf32>
    %148 = arith.mulf %140, %145 : vector<8x128xf32>
    %149 = arith.subf %147, %148 : vector<8x128xf32>
    %cst_53 = arith.constant 0.000000e+00 : f32
    %150 = vector.broadcast %cst_53 : f32 to vector<8x128xf32>
    %151 = arith.subf %150, %140 : vector<8x128xf32>
    %152 = arith.mulf %151, %141 : vector<8x128xf32>
    %153 = arith.mulf %139, %144 : vector<8x128xf32>
    %154 = arith.mulf %140, %146 : vector<8x128xf32>
    %155 = arith.addf %153, %154 : vector<8x128xf32>
    %156 = arith.mulf %140, %143 : vector<8x128xf32>
    %157 = arith.mulf %139, %145 : vector<8x128xf32>
    %158 = arith.addf %156, %157 : vector<8x128xf32>
    %159 = arith.mulf %139, %141 : vector<8x128xf32>
    %160 = arith.mulf %140, %144 : vector<8x128xf32>
    %161 = arith.mulf %139, %146 : vector<8x128xf32>
    %162 = arith.subf %160, %161 : vector<8x128xf32>
    %cst_54 = arith.constant 0.000000e+00 : f32
    %163 = vector.broadcast %cst_54 : f32 to vector<8x128xf32>
    %164 = arith.subf %163, %141 : vector<8x128xf32>
    %165 = arith.mulf %164, %144 : vector<8x128xf32>
    %166 = arith.mulf %141, %143 : vector<8x128xf32>
    %167 = arith.mulf %149, %128 : vector<8x128xf32>
    %168 = arith.mulf %167, %149 : vector<8x128xf32>
    %169 = arith.mulf %152, %130 : vector<8x128xf32>
    %170 = arith.mulf %169, %152 : vector<8x128xf32>
    %171 = arith.addf %168, %170 : vector<8x128xf32>
    %172 = arith.mulf %155, %132 : vector<8x128xf32>
    %173 = arith.mulf %172, %155 : vector<8x128xf32>
    %174 = arith.addf %171, %173 : vector<8x128xf32>
    %175 = arith.mulf %158, %128 : vector<8x128xf32>
    %176 = arith.mulf %175, %158 : vector<8x128xf32>
    %177 = arith.mulf %159, %130 : vector<8x128xf32>
    %178 = arith.mulf %177, %159 : vector<8x128xf32>
    %179 = arith.addf %176, %178 : vector<8x128xf32>
    %180 = arith.mulf %162, %132 : vector<8x128xf32>
    %181 = arith.mulf %180, %162 : vector<8x128xf32>
    %182 = arith.addf %179, %181 : vector<8x128xf32>
    %183 = arith.mulf %165, %128 : vector<8x128xf32>
    %184 = arith.mulf %183, %165 : vector<8x128xf32>
    %185 = arith.mulf %142, %130 : vector<8x128xf32>
    %186 = arith.mulf %185, %142 : vector<8x128xf32>
    %187 = arith.addf %184, %186 : vector<8x128xf32>
    %188 = arith.mulf %166, %132 : vector<8x128xf32>
    %189 = arith.mulf %188, %166 : vector<8x128xf32>
    %190 = arith.addf %187, %189 : vector<8x128xf32>
    %191 = arith.mulf %149, %128 : vector<8x128xf32>
    %192 = arith.mulf %191, %158 : vector<8x128xf32>
    %193 = arith.mulf %152, %130 : vector<8x128xf32>
    %194 = arith.mulf %193, %159 : vector<8x128xf32>
    %195 = arith.addf %192, %194 : vector<8x128xf32>
    %196 = arith.mulf %155, %132 : vector<8x128xf32>
    %197 = arith.mulf %196, %162 : vector<8x128xf32>
    %198 = arith.addf %195, %197 : vector<8x128xf32>
    %199 = arith.mulf %149, %128 : vector<8x128xf32>
    %200 = arith.mulf %199, %165 : vector<8x128xf32>
    %201 = arith.mulf %152, %130 : vector<8x128xf32>
    %202 = arith.mulf %201, %142 : vector<8x128xf32>
    %203 = arith.addf %200, %202 : vector<8x128xf32>
    %204 = arith.mulf %155, %132 : vector<8x128xf32>
    %205 = arith.mulf %204, %166 : vector<8x128xf32>
    %206 = arith.addf %203, %205 : vector<8x128xf32>
    %207 = arith.mulf %158, %128 : vector<8x128xf32>
    %208 = arith.mulf %207, %165 : vector<8x128xf32>
    %209 = arith.mulf %159, %130 : vector<8x128xf32>
    %210 = arith.mulf %209, %142 : vector<8x128xf32>
    %211 = arith.addf %208, %210 : vector<8x128xf32>
    %212 = arith.mulf %162, %132 : vector<8x128xf32>
    %213 = arith.mulf %212, %166 : vector<8x128xf32>
    %214 = arith.addf %211, %213 : vector<8x128xf32>
    %215 = arith.subf %80, %174 : vector<8x128xf32>
    %216 = arith.subf %80, %174 : vector<8x128xf32>
    %217 = arith.mulf %215, %216 : vector<8x128xf32>
    %218 = arith.subf %88, %182 : vector<8x128xf32>
    %219 = arith.subf %88, %182 : vector<8x128xf32>
    %220 = arith.mulf %218, %219 : vector<8x128xf32>
    %221 = arith.subf %96, %190 : vector<8x128xf32>
    %222 = arith.subf %96, %190 : vector<8x128xf32>
    %223 = arith.mulf %221, %222 : vector<8x128xf32>
    %224 = arith.subf %104, %198 : vector<8x128xf32>
    %225 = arith.subf %104, %198 : vector<8x128xf32>
    %226 = arith.mulf %224, %225 : vector<8x128xf32>
    %227 = arith.subf %112, %206 : vector<8x128xf32>
    %228 = arith.subf %112, %206 : vector<8x128xf32>
    %229 = arith.mulf %227, %228 : vector<8x128xf32>
    %230 = arith.subf %120, %214 : vector<8x128xf32>
    %231 = arith.subf %120, %214 : vector<8x128xf32>
    %232 = arith.mulf %230, %231 : vector<8x128xf32>
    %233 = arith.addf %217, %220 : vector<8x128xf32>
    %234 = arith.addf %233, %223 : vector<8x128xf32>
    %235 = arith.addf %226, %229 : vector<8x128xf32>
    %236 = arith.addf %235, %232 : vector<8x128xf32>
    %cst_55 = arith.constant 2.000000e+00 : f32
    %237 = vector.broadcast %cst_55 : f32 to vector<8x128xf32>
    %238 = arith.mulf %237, %236 : vector<8x128xf32>
    %239 = arith.addf %234, %238 : vector<8x128xf32>
    %240 = arith.addf %25, %239 : vector<8x128xf32>
    %cst_56 = arith.constant 1.000000e-07 : f32
    %241 = vector.broadcast %cst_56 : f32 to vector<8x128xf32>
    %242 = arith.maximumf %240, %241 : vector<8x128xf32>
    %243 = math.rsqrt %242 : vector<8x128xf32>
    %244 = arith.mulf %242, %243 : vector<8x128xf32>
    %cst_57 = arith.constant 1.000000e+00 : f32
    %245 = vector.broadcast %cst_57 : f32 to vector<8x128xf32>
    %246 = arith.mulf %245, %244 : vector<8x128xf32>
    %247 = arith.addf %26, %246 : vector<8x128xf32>
    %cst_58 = arith.constant 1.000000e-07 : f32
    %248 = vector.broadcast %cst_58 : f32 to vector<8x128xf32>
    %249 = arith.maximumf %25, %248 : vector<8x128xf32>
    %250 = math.rsqrt %249 : vector<8x128xf32>
    %251 = arith.mulf %249, %250 : vector<8x128xf32>
    %cst_59 = arith.constant 8.000000e-01 : f32
    %252 = vector.broadcast %cst_59 : f32 to vector<8x128xf32>
    %253 = arith.mulf %252, %251 : vector<8x128xf32>
    %254 = arith.addf %247, %253 : vector<8x128xf32>
    %c0_i32 = arith.constant 0 : i32
    %255 = arith.addi %0, %c0_i32 : i32
    %c128_i32_60 = arith.constant 128 : i32
    %256 = arith.muli %255, %c128_i32_60 : i32
    %257 = vector.broadcast %256 : i32 to vector<8x128xi32>
    %258 = arith.addi %257, %5 : vector<8x128xi32>
    %c8_i32_61 = arith.constant 8 : i32
    %259 = vector.broadcast %c8_i32_61 : i32 to vector<8x128xi32>
    %260 = arith.cmpi slt, %258, %259 : vector<8x128xi32>
    %cst_62 = arith.constant 0.000000e+00 : f32
    %261 = vector.broadcast %cst_62 : f32 to vector<8x128xf32>
    %262 = arith.select %260, %254, %261 : vector<8x128xi1>, vector<8x128xf32>
    %cst_63 = arith.constant dense<0.000000e+00> : vector<8xf32>
    %263 = vector.multi_reduction <add>, %262, %cst_63 [1] : vector<8x128xf32> to vector<8xf32>
    %264 = vector.shape_cast %263 : vector<8xf32> to vector<8x1xf32>
    %c0_64 = arith.constant 0 : index
    %c0_65 = arith.constant 0 : index
    %265 = vector.load %arg3[%c0_64, %c0_65] : memref<8x1xf32, #tpu.memory_space<vmem>>, vector<8x1xf32>
    tpu.vector_store %arg3[%c0_64, %c0_65], %264 {strides = array<i32>} : memref<8x1xf32, #tpu.memory_space<vmem>>, vector<8x1xf32>,
    return
  }
  func.func @transform_0(%arg0: i32) -> (i32, i32, i32) {
    %c0_i32 = arith.constant 0 : i32
    %c0_i32_0 = arith.constant 0 : i32
    %c0_i32_1 = arith.constant 0 : i32
    return %c0_i32, %arg0, %c0_i32_0 : i32, i32, i32
  }
  func.func @transform_1(%arg0: i32) -> (i32, i32, i32) {
    %c0_i32 = arith.constant 0 : i32
    %c0_i32_0 = arith.constant 0 : i32
    %c0_i32_1 = arith.constant 0 : i32
    return %c0_i32, %arg0, %c0_i32_0 : i32, i32, i32
  }
  func.func @transform_2(%arg0: i32) -> (i32, i32) {
    %c0_i32 = arith.constant 0 : i32
    %c0_i32_0 = arith.constant 0 : i32
    return %arg0, %c0_i32 : i32, i32
  }
}

</mosaic_0001>

<bundles_post_ra>
// kernel: tpu_custom_call.1
= control target key start
LH: loop header
LB: loop body
LE: loop exit
PB: predicated region body
PF: predicated region fallthrough
CT: control target
= control target key end

     0   :  { %7 = vsyncpa [#allocation3], 0  ;;  %s2524_s0 = inlined_call_operand.hbm [shape: f32[9,8,128], index: 0, kind: input, shape index: {}]   ;;  %s2525_s1 = inlined_call_operand.hbm [shape: f32[9,8,128], index: 1, kind: input, shape index: {}]   ;;  %s2526_s2 = inlined_call_operand.vmem [shape: f32[8,1], index: 2, kind: output, shape index: {}]  }
   0x1   :  { %8 = vsyncpa [#allocation5], 0  ;;  %s1656_s9 = smov [#allocation2]   ;;  %s1608_s13 = scalar_lea.hbm %s2524_s0, 1152 }
   0x2   :  { %s14_s10 = sshll.u32 %s1656_s9, 4  ;;  %p1609_p0 = scmp.ne.s32.totalorder %s2524_s0, %s1608_s13  ;;  %s15_s10 = int_to_ptr.vmem [resolvable:$true] %s14_s10 }
   0x3   :  { %p1612_p1 = scmp.lt.u32.totalorder %s1608_s13, %s2524_s0 }
   0x5   :  { %p1614_p2 = pnand %p1612_p1, %p1609_p0 }
   0x7   :  { %1617 = shalt.err (!%p1614_p2)
}
   0x8   :  { %s1618_s18 = scalar_lea.vmem %s15_s10, 1152  ;;  %p1623_p4 = scmp.lt.s32.totalorder %s15_s10, %s15_s10 }
   0x9   :  { %p1619_p3 = scmp.ne.s32.totalorder %s15_s10, %s1618_s18  ;;  %p1624_p5 = scmp.lt.s32.totalorder %s1618_s18, %s1618_s18 }
   0xb   :  { %p1625_p6 = por %p1624_p5, %p1623_p4 }
   0xd   :  { %p1626_p7 = pnand %p1625_p6, %p1619_p3 }
   0xf   :  { %1629 = shalt.err (!%p1626_p7)
}
  0x10   :  { %s1657_s19 = smov 128   ;;  %s1658_s20 = smov 8  }
  0x11   :  { %20 = dma.hbm_to_vmem [thread:$0]  %s2524_s0, 1152, %s15_s10, [#allocation3], %s1657_s19, %s1657_s19, %s1658_s20  }
  0x12   :  { %s1659_s23 = smov [#allocation4]   ;;  %s1630_s27 = scalar_lea.hbm %s2525_s1, 1152 }
  0x13   :  { %s26_s24 = sshll.u32 %s1659_s23, 4  ;;  %p1631_p8 = scmp.ne.s32.totalorder %s2525_s1, %s1630_s27  ;;  %s27_s24 = int_to_ptr.vmem [resolvable:$true] %s26_s24 }
  0x14   :  { %p1634_p9 = scmp.lt.u32.totalorder %s1630_s27, %s2525_s1 }
  0x16   :  { %p1636_p10 = pnand %p1634_p9, %p1631_p8 }
  0x18   :  { %1639 = shalt.err (!%p1636_p10)
}
  0x19   :  { %s1640_s4 = scalar_lea.vmem %s27_s24, 1152  ;;  %p1645_p12 = scmp.lt.s32.totalorder %s27_s24, %s27_s24 }
  0x1a   :  { %p1641_p11 = scmp.ne.s32.totalorder %s27_s24, %s1640_s4  ;;  %p1646_p13 = scmp.lt.s32.totalorder %s1640_s4, %s1640_s4 }
  0x1c   :  { %p1647_p0 = por %p1646_p13, %p1645_p12 }
  0x1e   :  { %p1648_p1 = pnand %p1647_p0, %p1641_p11 }
  0x20   :  { %1651 = shalt.err (!%p1648_p1)
}
  0x21   :  { %32 = dma.hbm_to_vmem [thread:$0]  %s2525_s1, 1152, %s27_s24, [#allocation5], %s1657_s19, %s1657_s19, %s1658_s20  }
  0x22   :  { %1652 = dma.done.wait [#allocation3], 1152  }
  0x23   :  { %1653 = vsyncadd [#allocation3], 4294966144 }
  0x24   :  { %1654 = dma.done.wait [#allocation5], 1152  }
  0x25   :  { %1655 = vsyncadd [#allocation5], 4294966144  ;;  %v1705_v0 = vld [vmem:[#allocation2 + $0x30] sm:$0xff]  ;;  %v1707_v1 = vld [vmem:[#allocation2 + $0x38] sm:$0xff]  ;;  %v2530_v15 = vmov 2102212464  }
  0x26   :  { %v81_v2 = vand.u32 2139095040, %v1705_v0  ;;  %v288_v4 = vand.u32 2139095040, %v1707_v1  ;;  %v1711_v9 = vld [vmem:[#allocation2 + $0x40] sm:$0xff]  ;;  %v1661_v17 = vmov 920167782  }
  0x27   :  { %v495_v13 = vand.u32 2139095040, %v1711_v9  ;;  %v1662_v20 = vmov 1326507024   ;;  %v78_v22 = vand.u32 2147483647, %v1705_v0 }
  0x28   :  { %v82_v3 = vshrl.u32 %v81_v2, 23  ;;  %v289_v7 = vshrl.u32 %v288_v4, 23  ;;  %v1663_v25 = vmov 683565275   ;;  %v2532_v27 = vmov 2475754826  }
  0x29   :  { %v496_v24 = vshrl.u32 %v495_v13, 23  ;;  %v2528_v30 = vmov 2131351028   ;;  %v85_v36 = vand.u32 8388607, %v78_v22 }
  0x2a   :  { %v1496_v5 = vadd.s32 4294967169, %v82_v3  ;;  %v1504_v11 = vadd.s32 4294967169, %v289_v7  ;;  %v285_v46 = vand.u32 2147483647, %v1707_v1  ;;  %v492_v2 = vand.u32 2147483647, %v1711_v9 }
  0x2b   :  { %v1512_v37 = vadd.s32 4294967169, %v496_v24  ;;  %v86_v44 = vor.u32 8388608, %v85_v36 }
  0x2c   :  { %v88_v6 = vadd.s32 1, %v1496_v5  ;;  %v295_v14 = vadd.s32 1, %v1504_v11  ;;  %v292_v55 = vand.u32 8388607, %v285_v46 }
  0x2d   :  { %v502_v45 = vadd.s32 1, %v1512_v37  ;;  %v1746_v52 = vshll.u32 %v86_v44, 8 }
  0x2e   :  { %vm89_vm0 = vcmp.gt.s32.totalorder %v88_v6, 0  ;;  %vm296_vm1 = vcmp.gt.s32.totalorder %v295_v14, 0  ;;  %v293_v3 = vor.u32 8388608, %v292_v55 }
  0x2f   :  { %v90_v8 = vsel %vm89_vm0, %v88_v6, 0  ;;  %v297_v41 = vsel %vm296_vm1, %v295_v14, 0  ;;  %vm503_vm6 = vcmp.gt.s32.totalorder %v502_v45, 0 }
  0x30   :  { %v92_v10 = vand.u32 31, %v90_v8  ;;  %v1719_v23 = vshrl.u32 %v90_v8, 5  ;;  %v299_v47 = vand.u32 31, %v297_v41  ;;  %v504_v58 = vsel %vm503_vm6, %v502_v45, 0 }
  0x31   :  { %v506_v6 = vand.u32 31, %v504_v58  ;;  %v1782_v14 = vshrl.u32 %v297_v41, 5  ;;  %v1790_v24 = vshll.u32 %v293_v3, 8  ;;  %v1820_v44 = vshrl.u32 %v504_v58, 5 }
  0x32   :  { %v93_v12 = vsub.s32 32, %v92_v10  ;;  %v104_v16 = vshll.u32 %v2530_v15, %v92_v10  ;;  %v107_v19 = vshll.u32 %v1661_v17, %v92_v10  ;;  %v95_v26 = vshll.u32 %v1663_v25, %v92_v10 }
  0x33   :  { %v98_v28 = vshll.u32 %v2532_v27, %v92_v10  ;;  %v101_v32 = vshll.u32 %v2528_v30, %v92_v10  ;;  %vm113_vm2 = vcmp.lt.s32.totalorder %v1719_v23, 4  ;;  %vm110_vm3 = vcmp.lt.s32.totalorder %v1719_v23, 1 }
  0x34   :  { %v105_v18 = vshrl.u32 %v1661_v17, %v93_v12  ;;  %v108_v21 = vshrl.u32 %v1662_v20, %v93_v12  ;;  %v96_v29 = vshrl.u32 %v2532_v27, %v93_v12  ;;  %v99_v31 = vshrl.u32 %v2528_v30, %v93_v12 }
  0x35   :  { %v102_v33 = vshrl.u32 %v2530_v15, %v93_v12  ;;  %vm112_vm4 = vcmp.lt.s32.totalorder %v1719_v23, 3  ;;  %vm111_vm5 = vcmp.lt.s32.totalorder %v1719_v23, 2  ;;  %v1754_v56 = vsub.s32 32, %v299_v47 }
  0x36   :  { %v106_v34 = vor.u32 %v105_v18, %v104_v16  ;;  %v109_v35 = vor.u32 %v108_v21, %v107_v19  ;;  %v97_v38 = vor.u32 %v96_v29, %v95_v26  ;;  %v100_v39 = vor.u32 %v99_v31, %v98_v28 }
  0x37   :  { %v103_v40 = vor.u32 %v102_v33, %v101_v32  ;;  %v94_v57 = vshrl.u32 %v1663_v25, %v93_v12  ;;  %v302_v4 = vshll.u32 %v1663_v25, %v299_v47  ;;  %v303_v5 = vshrl.u32 %v2532_v27, %v1754_v56 }
  0x38   :  { %v119_v42 = vsel %vm113_vm2, %v106_v34, 920167782  ;;  %v123_v43 = vsel %vm113_vm2, %v109_v35, 1326507024  ;;  %v118_v48 = vsel %vm110_vm3, %v97_v38, %v100_v39  ;;  %v305_v7 = vshll.u32 %v2532_v27, %v299_v47 }
  0x39   :  { %v120_v49 = vsel %vm112_vm4, %v103_v40, %v119_v42  ;;  %v122_v50 = vsel %vm110_vm3, %v100_v39, %v103_v40  ;;  %v124_v51 = vsel %vm112_vm4, %v106_v34, %v123_v43  ;;  %v115_v63 = vsel %vm113_vm2, %v103_v40, 2102212464 }
  0x3a   :  { %v121_v53 = vsel %vm111_vm5, %v118_v48, %v120_v49  ;;  %v125_v54 = vsel %vm111_vm5, %v122_v50, %v124_v51  ;;  %v306_v8 = vshrl.u32 %v2528_v30, %v1754_v56  ;;  %v311_v10 = vshll.u32 %v2530_v15, %v299_v47  ;;  %v1830_v49 = vld [vmem:[#allocation4 + $0x30] sm:$0xff] }
  0x3b   :  { %v1758_v59 = vmul.u32.u64.low %v1746_v52, %v125_v54  ;;  %v1759_v60 = vmul.u32.u64.high %v1746_v52, %v125_v54, %v1758_v59  ;;  %v1762_v61 = vmul.u32.u64.low %v1746_v52, %v121_v53  ;;  %v1763_v62 = vmul.u32.u64.high %v1746_v52, %v121_v53, %v1762_v61 }
  0x3c   :  { %v312_v11 = vshrl.u32 %v1661_v17, %v1754_v56  ;;  %v114_v12 = vsel %vm110_vm3, %v94_v57, %v97_v38  ;;  %v116_v13 = vsel %vm112_vm4, %v100_v39, %v115_v63  ;;  %v308_v16 = vshll.u32 %v2528_v30, %v299_v47 }
  0x3d   :  { %v309_v18 = vshrl.u32 %v2530_v15, %v1754_v56  ;;  %v314_v19 = vshll.u32 %v1661_v17, %v299_v47  ;;  %v315_v21 = vshrl.u32 %v1662_v20, %v1754_v56  ;;  %v499_v26 = vand.u32 8388607, %v492_v2 }
  0x3e   :  { %v1794_v28 = vsub.s32 32, %v506_v6  ;;  %v117_v29 = vsel %vm111_vm5, %v114_v12, %v116_v13  ;;  %v1798_v31 = vor.u32 %v303_v5, %v302_v4  ;;  %v1800_v32 = vor.u32 %v306_v8, %v305_v7 }
  0x3f   :  { %v313_v33 = vor.u32 %v312_v11, %v311_v10  ;;  %vm135_vm7 = vc.u32 %v1759_v60, %v1762_v61  ;;  %v136_v34 = vadd.s32 1, %v1763_v62  ;;  %vm317_vm8 = vcmp.lt.s32.totalorder %v1782_v14, 1 }
  0x40   :  { %vm320_vm9 = vcmp.lt.s32.totalorder %v1782_v14, 4  ;;  %v310_v35 = vor.u32 %v309_v18, %v308_v16  ;;  %v316_v36 = vor.u32 %v315_v21, %v314_v19  ;;  %v509_v37 = vshll.u32 %v1663_v25, %v506_v6 }
  0x41   :  { %v512_v23 = vshll.u32 %v2532_v27, %v506_v6  ;;  %v510_v38 = vshrl.u32 %v2532_v27, %v1794_v28  ;;  %v513_v39 = vshrl.u32 %v2528_v30, %v1794_v28  ;;  %v518_v40 = vshll.u32 %v2530_v15, %v506_v6 }
  0x42   :  { %v519_v41 = vshrl.u32 %v1661_v17, %v1794_v28  ;;  %v133_v42 = vmul.u32 %v1746_v52, %v117_v29  ;;  %vm319_vm10 = vcmp.lt.s32.totalorder %v1782_v14, 3  ;;  %v326_v43 = vsel %vm320_vm9, %v313_v33, 920167782 }
  0x43   :  { %v137_v45 = vsel %vm135_vm7, %v136_v34, %v1763_v62  ;;  %vm318_vm11 = vcmp.lt.s32.totalorder %v1782_v14, 2  ;;  %v515_v47 = vshll.u32 %v2528_v30, %v506_v6  ;;  %v516_v48 = vshrl.u32 %v2530_v15, %v1794_v28 }
  0x44   :  { %v325_v50 = vsel %vm317_vm8, %v1798_v31, %v1800_v32  ;;  %v330_v51 = vsel %vm320_vm9, %v316_v36, 1326507024  ;;  %v521_v52 = vshll.u32 %v1661_v17, %v506_v6  ;;  %v522_v53 = vshrl.u32 %v1662_v20, %v1794_v28 }
  0x45   :  { %v327_v54 = vsel %vm319_vm10, %v310_v35, %v326_v43  ;;  %v511_v55 = vor.u32 %v510_v38, %v509_v37  ;;  %v514_v57 = vor.u32 %v513_v39, %v512_v23  ;;  %v520_v58 = vor.u32 %v519_v41, %v518_v40 }
  0x46   :  { %v500_v59 = vor.u32 8388608, %v499_v26  ;;  %vm524_vm12 = vcmp.lt.s32.totalorder %v1820_v44, 1  ;;  %vm527_vm13 = vcmp.lt.s32.totalorder %v1820_v44, 4  ;;  %v776_v62 = vand.u32 2139095040, %v1830_v49 }
  0x47   :  { %v138_v63 = vadd.s32 %v137_v45, %v133_v42  ;;  %v329_v3 = vsel %vm317_vm8, %v1800_v32, %v310_v35  ;;  %v331_v4 = vsel %vm319_vm10, %v313_v33, %v330_v51  ;;  %v517_v5 = vor.u32 %v516_v48, %v515_v47 }
  0x48   :  { %v328_v6 = vsel %vm318_vm11, %v325_v50, %v327_v54  ;;  %v523_v7 = vor.u32 %v522_v53, %v521_v52  ;;  %vm526_vm14 = vcmp.lt.s32.totalorder %v1820_v44, 3  ;;  %vm525_vm15 = vcmp.lt.s32.totalorder %v1820_v44, 2 }
  0x49   :  { %v532_v8 = vsel %vm524_vm12, %v511_v55, %v514_v57  ;;  %v533_v10 = vsel %vm527_vm13, %v520_v58, 920167782  ;;  %v332_v11 = vsel %vm318_vm11, %v329_v3, %v331_v4  ;;  %v540_v12 = vshll.u32 %v500_v59, 8 }
  0x4a   :  { %v777_v13 = vshrl.u32 %v776_v62, 23  ;;  %v139_v16 = vadd.s32 536870912, %v138_v63  ;;  %v1862_v18 = vmul.u32.u64.low %v1790_v24, %v328_v6  ;;  %v1863_v19 = vmul.u32.u64.high %v1790_v24, %v328_v6, %v1862_v18 }
  0x4b   :  { %v534_v21 = vsel %vm526_vm14, %v517_v5, %v533_v10  ;;  %v536_v29 = vsel %vm524_vm12, %v514_v57, %v517_v5  ;;  %v537_v33 = vsel %vm527_vm13, %v523_v7, 1326507024  ;;  %v301_v34 = vshrl.u32 %v1663_v25, %v1754_v56 }
  0x4c   :  { %v535_v26 = vsel %vm525_vm15, %v532_v8, %v534_v21  ;;  %v1877_v36 = vmul.u32.u64.low %v1790_v24, %v332_v11  ;;  %v1878_v37 = vmul.u32.u64.high %v1790_v24, %v332_v11, %v1877_v36  ;;  %v322_v23 = vsel %vm320_vm9, %v310_v35, 2102212464 }
  0x4d   :  { %v538_v38 = vsel %vm526_vm14, %v520_v58, %v537_v33  ;;  %v1520_v39 = vadd.s32 4294967169, %v777_v13  ;;  %v1884_v40 = vshrl.u32 %v139_v16, 30  ;;  %v508_v56 = vshrl.u32 %v1663_v25, %v1794_v28 }
  0x4e   :  { %v539_v41 = vsel %vm525_vm15, %v536_v29, %v538_v38  ;;  %v1888_v42 = vmul.u32.u64.low %v540_v12, %v535_v26  ;;  %v1889_v43 = vmul.u32.u64.high %v540_v12, %v535_v26, %v1888_v42  ;;  %v321_v48 = vsel %vm317_vm8, %v301_v34, %v1798_v31 }
  0x4f   :  { %v1894_v45 = vmul.u32.u64.low %v540_v12, %v539_v41  ;;  %v1895_v47 = vmul.u32.u64.high %v540_v12, %v539_v41, %v1894_v45  ;;  %v783_v35 = vadd.s32 1, %v1520_v39  ;;  %v323_v50 = vsel %vm319_vm10, %v1800_v32, %v322_v23 }
  0x50   :  { %v529_v51 = vsel %vm527_vm13, %v517_v5, 2102212464  ;;  %v141_v52 = vshll.u32 %v1884_v40, 30  ;;  %v324_v28 = vsel %vm318_vm11, %v321_v48, %v323_v50  ;;  %v343_v54 = vadd.s32 1, %v1863_v19 }
  0x51   :  { %vm784_vm0 = vcmp.gt.s32.totalorder %v783_v35, 0  ;;  %v528_v58 = vsel %vm524_vm12, %v508_v56, %v511_v55  ;;  %v530_v31 = vsel %vm526_vm14, %v514_v57, %v529_v51  ;;  %vm342_vm1 = vc.u32 %v1878_v37, %v1862_v18 }
  0x52   :  { %v785_v53 = vsel %vm784_vm0, %v783_v35, 0  ;;  %v1915_v59 = vsub.s32 %v138_v63, %v141_v52  ;;  %v340_v62 = vmul.u32 %v1790_v24, %v324_v28  ;;  %v531_v14 = vsel %vm525_vm15, %v528_v58, %v530_v31 }
  0x53   :  { %v787_v32 = vand.u32 31, %v785_v53  ;;  %v550_v3 = vadd.s32 1, %v1889_v43  ;;  %v344_v4 = vsel %vm342_vm1, %v343_v54, %v1863_v19  ;;  %vm549_vm2 = vc.u32 %v1895_v47, %v1888_v42 }
  0x54   :  { %v547_v55 = vmul.u32 %v540_v12, %v531_v14  ;;  %v144_v5 = vsub.s32 0, %v1915_v59  ;;  %v345_v6 = vadd.s32 %v344_v4, %v340_v62  ;;  %v2527_v11 = vand.u32 2147483647, %v1830_v49 }
  0x55   :  { %v788_v57 = vsub.s32 32, %v787_v32  ;;  %v551_v63 = vsel %vm549_vm2, %v550_v3, %v1889_v43  ;;  %v799_v24 = vshll.u32 %v2530_v15, %v787_v32  ;;  %v1930_v13 = vshrl.u32 %v785_v53, 5 }
  0x56   :  { %v552_v7 = vadd.s32 %v551_v63, %v547_v55  ;;  %v1497_v8 = vmin.u32 %v144_v5, %v1915_v59  ;;  %v346_v10 = vadd.s32 536870912, %v345_v6  ;;  %v790_v12 = vshll.u32 %v1663_v25, %v787_v32 }
  0x57   :  { %v800_v44 = vshrl.u32 %v1661_v17, %v788_v57  ;;  %v791_v16 = vshrl.u32 %v2532_v27, %v788_v57  ;;  %v793_v19 = vshll.u32 %v2532_v27, %v787_v32  ;;  %v794_v21 = vshrl.u32 %v2528_v30, %v788_v57 }
  0x58   :  { %v796_v26 = vshll.u32 %v2528_v30, %v787_v32  ;;  %v797_v29 = vshrl.u32 %v2530_v15, %v788_v57  ;;  %v802_v33 = vshll.u32 %v1661_v17, %v787_v32  ;;  %v803_v34 = vshrl.u32 %v1662_v20, %v788_v57  ;;  %v1960_v32 = vld [vmem:[#allocation4 + $0x38] sm:$0xff] }
  0x59   :  { %v553_v36 = vadd.s32 536870912, %v552_v7  ;;  %v801_v23 = vor.u32 %v800_v44, %v799_v24  ;;  %v1940_v38 = vshrl.u32 %v346_v10, 30  ;;  %v780_v39 = vand.u32 8388607, %v2527_v11 }
  0x5a   :  { %vm808_vm3 = vcmp.lt.s32.totalorder %v1930_v13, 4  ;;  %v146_v41 = vclz %v1497_v8  ;;  %v792_v43 = vor.u32 %v791_v16, %v790_v12  ;;  %v795_v56 = vor.u32 %v794_v21, %v793_v19 }
  0x5b   :  { %v798_v45 = vor.u32 %v797_v29, %v796_v26  ;;  %v804_v35 = vor.u32 %v803_v34, %v802_v33  ;;  %v1945_v48 = vshrl.u32 %v553_v36, 30  ;;  %vm805_vm4 = vcmp.lt.s32.totalorder %v1930_v13, 1 }
  0x5c   :  { %vm807_vm5 = vcmp.lt.s32.totalorder %v1930_v13, 3  ;;  %v814_v50 = vsel %vm808_vm3, %v801_v23, 920167782  ;;  %v348_v51 = vshll.u32 %v1940_v38, 30  ;;  %v781_v52 = vor.u32 8388608, %v780_v39 }
  0x5d   :  { %v1498_v53 = vadd.s32 4294967294, %v146_v41  ;;  %vm806_vm6 = vcmp.lt.s32.totalorder %v1930_v13, 2  ;;  %v813_v28 = vsel %vm805_vm4, %v792_v43, %v795_v56  ;;  %v815_v54 = vsel %vm807_vm5, %v798_v45, %v814_v50 }
  0x5e   :  { %v818_v58 = vsel %vm808_vm3, %v804_v35, 1326507024  ;;  %v555_v31 = vshll.u32 %v1945_v48, 30  ;;  %v817_v62 = vsel %vm805_vm4, %v795_v56, %v798_v45  ;;  %v1966_v3 = vsub.s32 %v345_v6, %v348_v51 }
  0x5f   :  { %v819_v14 = vsel %vm807_vm5, %v801_v23, %v818_v58  ;;  %v821_v4 = vshll.u32 %v781_v52, 8  ;;  %vm1499_vm7 = vcmp.lt.s32.totalorder %v1498_v53, 0  ;;  %v816_v55 = vsel %vm806_vm6, %v813_v28, %v815_v54 }
  0x60   :  { %v820_v5 = vsel %vm806_vm6, %v817_v62, %v819_v14  ;;  %v983_v63 = vand.u32 2139095040, %v1960_v32  ;;  %v1973_v24 = vsub.s32 %v552_v7, %v555_v31  ;;  %v149_v44 = vsel %vm1499_vm7, 0, %v1498_v53 }
  0x61   :  { %v351_v8 = vsub.s32 0, %v1966_v3  ;;  %v1976_v10 = vmul.u32.u64.low %v821_v4, %v816_v55  ;;  %v1977_v12 = vmul.u32.u64.high %v821_v4, %v816_v55, %v1976_v10  ;;  %v789_v6 = vshrl.u32 %v1663_v25, %v788_v57  ;;  %v45_v55 = vld [vmem:[#allocation2] sm:$0xff] }
  0x62   :  { %v1981_v16 = vmul.u32.u64.low %v821_v4, %v820_v5  ;;  %v1982_v19 = vmul.u32.u64.high %v821_v4, %v820_v5, %v1981_v16  ;;  %v984_v21 = vshrl.u32 %v983_v63, 23  ;;  %v810_v26 = vsel %vm808_vm3, %v798_v45, 2102212464  ;;  %v47_v63 = vld [vmem:[#allocation2 + $0x8] sm:$0xff] }
  0x63   :  { %v558_v29 = vsub.s32 0, %v1973_v24  ;;  %v154_v7 = vsub.s32 4294967266, %v149_v44  ;;  %v1505_v33 = vmin.u32 %v351_v8, %v1966_v3  ;;  %v809_v34 = vsel %vm805_vm4, %v789_v6, %v792_v43  ;;  %v50_v8 = vld [vmem:[#allocation4] sm:$0xff]  ;;  %v52_v6 = vld [vmem:[#allocation4 + $0x8] sm:$0xff] }
  0x64   :  { %v811_v36 = vsel %vm807_vm5, %v795_v56, %v810_v26  ;;  %v1528_v23 = vadd.s32 4294967169, %v984_v21  ;;  %v134_v57 = vadd.s32 %v1762_v61, %v1759_v60  ;;  %v150_v39 = vsub.s32 32, %v149_v44  ;;  %v66_v26 = vld [vmem:[#allocation2 + $0x20] sm:$0xff] }
  0x65   :  { %v1513_v41 = vmin.u32 %v558_v29, %v1973_v24  ;;  %v155_v45 = vadd.s32 127, %v154_v7  ;;  %v353_v50 = vclz %v1505_v33  ;;  %v812_v51 = vsel %vm806_vm6, %v809_v34, %v811_v36  ;;  %v68_v29 = vld [vmem:[#allocation2 + $0x28] sm:$0xff] }
  0x66   :  { %v990_v35 = vadd.s32 1, %v1528_v23  ;;  %v831_v52 = vadd.s32 1, %v1977_v12  ;;  %vm830_vm8 = vc.u32 %v1982_v19, %v1976_v10  ;;  %v151_v43 = vshll.u32 %v1915_v59, %v149_v44  ;;  %v49_v59 = vld [vmem:[#allocation2 + $0x10] sm:$0xff]  ;;  %v54_v44 = vld [vmem:[#allocation4 + $0x10] sm:$0xff] }
  0x67   :  { %v560_v56 = vclz %v1513_v41  ;;  %v828_v53 = vmul.u32 %v821_v4, %v812_v51  ;;  %v152_v60 = vshrl.u32 %v134_v57, %v150_v39  ;;  %v156_v61 = vshll.u32 %v155_v45, 23  ;;  %v64_v4 = vld [vmem:[#allocation2 + $0x18] sm:$0xff] }
  0x68   :  { %vm991_vm9 = vcmp.gt.s32.totalorder %v990_v35, 0  ;;  %v1506_v28 = vadd.s32 4294967294, %v353_v50  ;;  %v832_v54 = vsel %vm830_vm8, %v831_v52, %v1977_v12  ;;  %v2002_v33 = vsub.f32 %v45_v55, %v50_v8 }
  0x69   :  { %v992_v58 = vsel %vm991_vm9, %v990_v35, 0  ;;  %v1514_v31 = vadd.s32 4294967294, %v560_v56  ;;  %v833_v62 = vadd.s32 %v832_v54, %v828_v53  ;;  %v153_v13 = vor.u32 %v152_v60, %v151_v43 }
  0x6a   :  { %v157_v14 = vor.u32 4788187, %v156_v61  ;;  %vm1507_vm10 = vcmp.lt.s32.totalorder %v1506_v28, 0  ;;  %v994_v5 = vand.u32 31, %v992_v58  ;;  %v2004_v34 = vsub.f32 %v47_v63, %v52_v6 }
  0x6b   :  { %v356_v16 = vsel %vm1507_vm10, 0, %v1506_v28  ;;  %vm1515_vm11 = vcmp.lt.s32.totalorder %v1514_v31, 0  ;;  %v834_v21 = vadd.s32 536870912, %v833_v62  ;;  %v160_v7 = vcvt.s32.f32 %v153_v13 }
  0x6c   :  { %v158_v12 = vand.u32 2147483647, %v157_v14  ;;  %v995_v36 = vsub.s32 32, %v994_v5  ;;  %v2006_v23 = vsub.f32 %v49_v59, %v54_v44  ;;  %v2008_v57 = vmul.f32 0.5, %v64_v4 }
  0x6d   :  { %v361_v39 = vsub.s32 4294967266, %v356_v16  ;;  %v563_v41 = vsel %vm1515_vm11, 0, %v1514_v31  ;;  %v2010_v35 = vmul.f32 0.5, %v66_v26  ;;  %v2012_v45 = vmul.f32 0.5, %v68_v29 }
  0x6e   :  { %vm80_vm12 = vcmp.lt.s32.totalorder %v1705_v0, 0  ;;  %v2015_v50 = vshrl.u32 %v834_v21, 30  ;;  %v161_v51 = vmul.f32 %v160_v7, %v158_v12  ;;  %v164_v52 = vsub.s32 4, %v1884_v40 }
  0x6f   :  { %v341_v43 = vadd.s32 %v1862_v18, %v1878_v37  ;;  %v371_v56 = vsub.s32 4, %v1940_v38  ;;  %v568_v53 = vsub.s32 4294967266, %v563_v41  ;;  %v980_v60 = vand.u32 2147483647, %v1960_v32 }
  0x70   :  { %v1006_v61 = vshll.u32 %v2530_v15, %v994_v5  ;;  %v1007_v28 = vshrl.u32 %v1661_v17, %v995_v36  ;;  %v357_v54 = vsub.s32 32, %v356_v16  ;;  %v362_v31 = vadd.s32 127, %v361_v39 }
  0x71   :  { %v548_v13 = vadd.s32 %v1888_v42, %v1895_v47  ;;  %v2026_v14 = vshrl.u32 %v992_v58, 5  ;;  %vm2030_vm13 = vcmp.le.f32.partialorder %v78_v22, 0.7853982  ;;  %v564_v37 = vsub.s32 32, %v563_v41 }
  0x72   :  { %v836_v55 = vshll.u32 %v2015_v50, 30  ;;  %v997_v63 = vshll.u32 %v1663_v25, %v994_v5  ;;  %v998_v8 = vshrl.u32 %v2532_v27, %v995_v36  ;;  %v1000_v6 = vshll.u32 %v2532_v27, %v994_v5 }
  0x73   :  { %v1001_v59 = vshrl.u32 %v2528_v30, %v995_v36  ;;  %v1003_v42 = vshll.u32 %v2528_v30, %v994_v5  ;;  %v1004_v47 = vshrl.u32 %v2530_v15, %v995_v36  ;;  %v162_v58 = vxor.u32 2147483648, %v161_v51  ;;  %v2048_v30 = vld [vmem:[#allocation4 + $0x40] sm:$0xff] }
  0x74   :  { %v358_v22 = vshll.u32 %v1966_v3, %v356_v16  ;;  %v569_v44 = vadd.s32 127, %v568_v53  ;;  %v1008_v4 = vor.u32 %v1007_v28, %v1006_v61  ;;  %v359_v21 = vshrl.u32 %v341_v43, %v357_v54 }
  0x75   :  { %v363_v26 = vshll.u32 %v362_v31, 23  ;;  %v987_v29 = vand.u32 8388607, %v980_v60  ;;  %vm1015_vm14 = vcmp.lt.s32.totalorder %v2026_v14, 4  ;;  %v565_v12 = vshll.u32 %v1973_v24, %v563_v41 }
  0x76   :  { %v566_v7 = vshrl.u32 %v548_v13, %v564_v37  ;;  %v2046_v39 = vsub.s32 %v833_v62, %v836_v55  ;;  %v999_v11 = vor.u32 %v998_v8, %v997_v63  ;;  %v1002_v15 = vor.u32 %v1001_v59, %v1000_v6 }
  0x77   :  { %v1005_v27 = vor.u32 %v1004_v47, %v1003_v42  ;;  %v1009_v3 = vshll.u32 %v1661_v17, %v994_v5  ;;  %v1010_v16 = vshrl.u32 %v1662_v20, %v995_v36  ;;  %v570_v43 = vshll.u32 %v569_v44, 23 }
  0x78   :  { %vm1012_vm15 = vcmp.lt.s32.totalorder %v2026_v14, 1  ;;  %vm1014_vm0 = vcmp.lt.s32.totalorder %v2026_v14, 3  ;;  %v1021_v24 = vsel %vm1015_vm14, %v1008_v4, 920167782  ;;  %v163_v62 = vsel %vm80_vm12, %v162_v58, %v161_v51 }
  0x79   :  { %v360_v41 = vor.u32 %v359_v21, %v358_v22  ;;  %v364_v53 = vor.u32 4788187, %v363_v26  ;;  %v988_v61 = vor.u32 8388608, %v987_v29  ;;  %v839_v28 = vsub.s32 0, %v2046_v39 }
  0x7a   :  { %v996_v5 = vshrl.u32 %v1663_v25, %v995_v36  ;;  %vm1013_vm1 = vcmp.lt.s32.totalorder %v2026_v14, 2  ;;  %v1190_v54 = vand.u32 2139095040, %v2048_v30  ;;  %v1011_v31 = vor.u32 %v1010_v16, %v1009_v3 }
  0x7b   :  { %v1017_v13 = vsel %vm1015_vm14, %v1005_v27, 2102212464  ;;  %v1020_v37 = vsel %vm1012_vm15, %v999_v11, %v1002_v15  ;;  %v1022_v51 = vsel %vm1014_vm0, %v1005_v27, %v1021_v24  ;;  %v165_v55 = vsel %vm80_vm12, %v164_v52, %v1884_v40 }
  0x7c   :  { %vm287_vm2 = vcmp.lt.s32.totalorder %v1707_v1, 0  ;;  %v567_v36 = vor.u32 %v566_v7, %v565_v12  ;;  %v571_v63 = vor.u32 4788187, %v570_v43  ;;  %v166_v8 = vsel %vm2030_vm13, %v1705_v0, %v163_v62 }
  0x7d   :  { %v365_v6 = vand.u32 2147483647, %v364_v53  ;;  %v367_v59 = vcvt.s32.f32 %v360_v41  ;;  %v1028_v42 = vshll.u32 %v988_v61, 8  ;;  %v1016_v47 = vsel %vm1012_vm15, %v996_v5, %v999_v11 }
  0x7e   :  { %v1018_v58 = vsel %vm1014_vm0, %v1002_v15, %v1017_v13  ;;  %v1023_v40 = vsel %vm1013_vm1, %v1020_v37, %v1022_v51  ;;  %v1024_v52 = vsel %vm1012_vm15, %v1002_v15, %v1005_v27  ;;  %v372_v22 = vsel %vm287_vm2, %v371_v56, %v1940_v38 }
  0x7f   :  { %v1521_v44 = vmin.u32 %v839_v28, %v2046_v39  ;;  %v1025_v11 = vsel %vm1015_vm14, %v1011_v31, 1326507024  ;;  %v1191_v21 = vshrl.u32 %v1190_v54, 23  ;;  %1578 = vcosq.f32 %v166_v8 }
  0x80   :  { %v572_v26 = vand.u32 2147483647, %v571_v63  ;;  %v574_v29 = vcvt.s32.f32 %v567_v36  ;;  %v1026_v12 = vsel %vm1014_vm0, %v1008_v4, %v1025_v11  ;;  %v1019_v15 = vsel %vm1013_vm1, %v1016_v47, %v1018_v58 }
  0x81   :  { %v1027_v27 = vsel %vm1013_vm1, %v1024_v52, %v1026_v12  ;;  %v2097_v7 = vmul.u32.u64.low %v1028_v42, %v1023_v40  ;;  %v2098_v38 = vmul.u32.u64.high %v1028_v42, %v1023_v40, %v2097_v7  ;;  %v368_v56 = vmul.f32 %v367_v59, %v365_v6 }
  0x82   :  { %v578_v3 = vsub.s32 4, %v1945_v48  ;;  %v2102_v16 = vmul.u32.u64.low %v1028_v42, %v1027_v27  ;;  %v2103_v43 = vmul.u32.u64.high %v1028_v42, %v1027_v27, %v2102_v16  ;;  %v58_v24 = vmul.f32 %v2002_v33, %v2002_v33 }
  0x83   :  { %vm2109_vm3 = vcmp.le.f32.partialorder %v285_v46, 0.7853982  ;;  %v841_v14 = vclz %v1521_v44  ;;  %v1536_v62 = vadd.s32 4294967169, %v1191_v21  ;;  %v167_v41 = vsel %vm2030_vm13, 0, %v165_v55 }
  0x84   :  { %1580 = vsinq.f32 %v166_v8  ;;  %vm494_vm4 = vcmp.lt.s32.totalorder %v1711_v9, 0  ;;  %v1035_v53 = vmul.u32 %v1028_v42, %v1019_v15  ;;  %v374_v61 = vsel %vm2109_vm3, 0, %v372_v22 }
  0x85   :  { %v575_v28 = vmul.f32 %v574_v29, %v572_v26  ;;  %v1038_v33 = vadd.s32 1, %v2098_v38  ;;  %v1197_v5 = vadd.s32 1, %v1536_v62  ;;  %v59_v46 = vmul.f32 %v2004_v34, %v2004_v34 }
  0x86   :  { %v369_v54 = vxor.u32 2147483648, %v368_v56  ;;  %v579_v18 = vsel %vm494_vm4, %v578_v3, %v1945_v48  ;;  %vm1037_vm5 = vc.u32 %v2103_v43, %v2097_v7  ;;  %v274_v31 = vadd.s32 3, %v167_v41 }
  0x87   :  { %v1522_v13 = vadd.s32 4294967294, %v841_v14  ;;  %v1039_v37 = vsel %vm1037_vm5, %v1038_v33, %v2098_v38  ;;  %vm1198_vm6 = vcmp.gt.s32.totalorder %v1197_v5, 0  ;;  %v481_v51 = vadd.s32 3, %v374_v61 }
  0x88   :  { %vm2129_vm7 = vcmp.le.f32.partialorder %v492_v2, 0.7853982  ;;  %v1040_v34 = vadd.s32 %v1039_v37, %v1035_v53  ;;  %v1199_v36 = vsel %vm1198_vm6, %v1197_v5, 0  ;;  %v576_v63 = vxor.u32 2147483648, %v575_v28 }
  0x89   :  { %v2135_v48 = vsel %vm2129_vm7, 0, %v579_v18  ;;  %v1187_v8 = vand.u32 2147483647, %v2048_v30  ;;  %v1201_v6 = vand.u32 31, %v1199_v36  ;;  %v2138_v59 = vpop.eup %1578  ;;  %v2140_v42 = vadd.f32 %v59_v46, %v58_v24 }
  0x8a   :  { %v2144_v2 = vmul.f32 %v2006_v23, %v2006_v23  ;;  %v370_v47 = vsel %vm287_vm2, %v369_v54, %v368_v56  ;;  %v1041_v58 = vadd.s32 536870912, %v1040_v34  ;;  %v2148_v40 = vand.u32 3, %v167_v41 }
  0x8b   :  { %v2150_v52 = vand.u32 3, %v274_v31  ;;  %vm1523_vm8 = vcmp.lt.s32.totalorder %v1522_v13, 0  ;;  %v1202_v22 = vsub.s32 32, %v1201_v6  ;;  %v2152_v44 = vand.u32 3, %v374_v61 }
  0x8c   :  { %v2154_v11 = vand.u32 3, %v481_v51  ;;  %v2157_v21 = vadd.s32 3, %v2135_v48  ;;  %v2159_v26 = vshrl.u32 %v1041_v58, 30  ;;  %v177_v23 = vxor.u32 2147483648, %v2138_v59 }
  0x8d   :  { %v373_v29 = vsel %vm2109_vm3, %v1707_v1, %v370_v47  ;;  %v577_v12 = vsel %vm494_vm4, %v576_v63, %v575_v28  ;;  %v1194_v15 = vand.u32 8388607, %v1187_v8  ;;  %v2171_v38 = vsel %vm1523_vm8, 0, %v1522_v13 }
  0x8e   :  { %v2169_v27 = vpop.eup %1580  ;;  %v1043_v56 = vshll.u32 %v2159_v26, 30  ;;  %v1204_v3 = vshll.u32 %v1663_v25, %v1201_v6  ;;  %v2540_v16 = vmov 2475754826   ;;  %v2541_v4 = vmov 2131351028  }
  0x8f   :  { %v1207_v24 = vshll.u32 %v2540_v16, %v1201_v6  ;;  %v1205_v14 = vshrl.u32 %v2540_v16, %v1202_v22  ;;  %v1208_v62 = vshrl.u32 %v2541_v4, %v1202_v22  ;;  %v2542_v41 = vmov 2102212464  }
  0x90   :  { %v1213_v53 = vshll.u32 %v2542_v41, %v1201_v6  ;;  %v1214_v61 = vshrl.u32 %v1661_v17, %v1202_v22  ;;  %v2180_v28 = vsub.s32 %v1040_v34, %v1043_v56  ;;  %v2182_v33 = vshrl.u32 %v1199_v36, 5 }
  0x91   :  { %v1210_v5 = vshll.u32 %v2541_v4, %v1201_v6  ;;  %v1211_v46 = vshrl.u32 %v2542_v41, %v1202_v22  ;;  %v174_v54 = vxor.u32 2147483648, %v2169_v27  ;;  %1582 = vcosq.f32 %v373_v29 }
  0x92   :  { %v1216_v18 = vshll.u32 %v1661_v17, %v1201_v6  ;;  %v1217_v31 = vshrl.u32 %v1662_v20, %v1202_v22  ;;  %vm280_vm9 = vcmp.eq.s32.totalorder %v2150_v52, 2  ;;  %1584 = vsinq.f32 %v373_v29 }
  0x93   :  { %v580_v13 = vsel %vm2129_vm7, %v1711_v9, %v577_v12  ;;  %v849_v37 = vsub.s32 4294967266, %v2171_v38  ;;  %v1046_v51 = vsub.s32 0, %v2180_v28  ;;  %vm277_vm10 = vcmp.eq.s32.totalorder %v2150_v52, 0 }
  0x94   :  { %v1195_v34 = vor.u32 8388608, %v1194_v15  ;;  %v1206_v36 = vor.u32 %v1205_v14, %v1204_v3  ;;  %v1209_v63 = vor.u32 %v1208_v62, %v1207_v24  ;;  %v1215_v47 = vor.u32 %v1214_v61, %v1213_v53 }
  0x95   :  { %v1529_v17 = vmin.u32 %v1046_v51, %v2180_v28  ;;  %v1212_v20 = vor.u32 %v1211_v46, %v1210_v5  ;;  %vm1219_vm11 = vcmp.lt.s32.totalorder %v2182_v33, 1  ;;  %vm1222_vm12 = vcmp.lt.s32.totalorder %v2182_v33, 4 }
  0x96   :  { %1586 = vcosq.f32 %v580_v13  ;;  %v829_v9 = vadd.s32 %v1976_v10, %v1982_v19  ;;  %v1203_v55 = vshrl.u32 %v1663_v25, %v1202_v22  ;;  %v1218_v6 = vor.u32 %v1217_v31, %v1216_v18 }
  0x97   :  { %vm276_vm13 = vcmp.lt.s32.totalorder %v2150_v52, 2  ;;  %vm380_vm14 = vcmp.eq.s32.totalorder %v2152_v44, 0  ;;  %vm383_vm15 = vcmp.eq.s32.totalorder %v2152_v44, 2  ;;  %1588 = vsinq.f32 %v580_v13 }
  0x98   :  { %v1048_v58 = vclz %v1529_v17  ;;  %vm1221_vm0 = vcmp.lt.s32.totalorder %v2182_v33, 3  ;;  %v1224_v29 = vsel %vm1222_vm12, %v1212_v20, 2102212464  ;;  %vm1220_vm1 = vcmp.lt.s32.totalorder %v2182_v33, 2 }
  0x99   :  { %v1227_v10 = vsel %vm1219_vm11, %v1206_v36, %v1209_v63  ;;  %v1228_v25 = vsel %vm1222_vm12, %v1215_v47, 920167782  ;;  %v1235_v19 = vshll.u32 %v1195_v34, 8  ;;  %vm173_vm2 = vcmp.eq.s32.totalorder %v2148_v40, 0 }
  0x9a   :  { %vm176_vm3 = vcmp.eq.s32.totalorder %v2148_v40, 2  ;;  %v845_v22 = vsub.s32 32, %v2171_v38  ;;  %v850_v12 = vadd.s32 127, %v849_v37  ;;  %v1530_v15 = vadd.s32 4294967294, %v1048_v58 }
  0x9b   :  { %v1231_v56 = vsel %vm1219_vm11, %v1209_v63, %v1212_v20  ;;  %vm170_vm4 = vweird.f32 %v1705_v0  ;;  %v1223_v3 = vsel %vm1219_vm11, %v1203_v55, %v1206_v36  ;;  %v1225_v16 = vsel %vm1221_vm0, %v1209_v63, %v1224_v29  ;;  %v1583_v53 = vpop.eup %1582 }
  0x9c   :  { %v1229_v24 = vsel %vm1221_vm0, %v1212_v20, %v1228_v25  ;;  %v1232_v14 = vsel %vm1222_vm12, %v1218_v6, 1326507024  ;;  %vm379_vm5 = vcmp.lt.s32.totalorder %v2152_v44, 2  ;;  %v846_v4 = vshll.u32 %v2046_v39, %v2171_v38  ;;  %v1585_v31 = vpop.eup %1584 }
  0x9d   :  { %vm1531_vm6 = vcmp.lt.s32.totalorder %v1530_v15, 0  ;;  %v1230_v62 = vsel %vm1220_vm1, %v1227_v10, %v1229_v24  ;;  %v1233_v41 = vsel %vm1221_vm0, %v1215_v47, %v1232_v14  ;;  %vm172_vm7 = vcmp.lt.s32.totalorder %v2148_v40, 2 }
  0x9e   :  { %v1051_v61 = vsel %vm1531_vm6, 0, %v1530_v15  ;;  %v1234_v5 = vsel %vm1220_vm1, %v1231_v56, %v1233_v41  ;;  %v2237_v46 = vmul.u32.u64.low %v1235_v19, %v1230_v62  ;;  %v2238_v18 = vmul.u32.u64.high %v1235_v19, %v1230_v62, %v2237_v46 }
  0x9f   :  { %v847_v39 = vshrl.u32 %v829_v9, %v845_v22  ;;  %v851_v38 = vshll.u32 %v850_v12, 23  ;;  %v1056_v13 = vsub.s32 4294967266, %v1051_v61  ;;  %v1226_v37 = vsel %vm1220_vm1, %v1223_v3, %v1225_v16 }
  0xa0   :  { %v282_v51 = vsel %vm280_vm9, %v177_v23, %v2169_v27  ;;  %vm484_vm8 = vcmp.eq.s32.totalorder %v2154_v11, 0  ;;  %v2249_v34 = vmul.u32.u64.low %v1235_v19, %v1234_v5  ;;  %v2250_v36 = vmul.u32.u64.high %v1235_v19, %v1234_v5, %v2249_v34  ;;  %v2259_v20 = vpop.eup %1586 }
  0xa1   :  { %v279_v63 = vsel %vm277_vm10, %v2138_v59, %v174_v54  ;;  %v1036_v33 = vadd.s32 %v2097_v7, %v2103_v43  ;;  %v1052_v47 = vsub.s32 32, %v1051_v61  ;;  %v1057_v17 = vadd.s32 127, %v1056_v13  ;;  %v1589_v29 = vpop.eup %1588  ;;  %v759_v13 = vld [vmem:[#allocation4 + $0x18] sm:$0xff] }
  0xa2   :  { %vm377_vm9 = vweird.f32 %v1707_v1  ;;  %v381_v9 = vxor.u32 2147483648, %v1585_v31  ;;  %v384_v55 = vxor.u32 2147483648, %v1583_v53  ;;  %vm483_vm11 = vcmp.lt.s32.totalorder %v2154_v11, 2 }
  0xa3   :  { %v1242_v6 = vmul.u32 %v1235_v19, %v1226_v37  ;;  %v1245_v58 = vadd.s32 1, %v2238_v18  ;;  %v2265_v10 = vand.u32 3, %v2135_v48  ;;  %v2268_v25 = vand.u32 3, %v2157_v21 }
  0xa4   :  { %v848_v7 = vor.u32 %v847_v39, %v846_v4  ;;  %v852_v43 = vor.u32 4788187, %v851_v38  ;;  %v283_v22 = vsel %vm276_vm13, %v279_v63, %v282_v51  ;;  %v382_v12 = vsel %vm380_vm14, %v1583_v53, %v381_v9 }
  0xa5   :  { %v385_v19 = vsel %vm383_vm15, %v384_v55, %v1585_v31  ;;  %vm1244_vm10 = vc.u32 %v2250_v36, %v2237_v46  ;;  %v1053_v48 = vshll.u32 %v2180_v28, %v1051_v61  ;;  %v1054_v15 = vshrl.u32 %v1036_v33, %v1052_v47  ;;  %v761_v47 = vld [vmem:[#allocation4 + $0x20] sm:$0xff] }
  0xa6   :  { %v1058_v56 = vshll.u32 %v1057_v17, 23  ;;  %v1246_v21 = vsel %vm1244_vm10, %v1245_v58, %v2238_v18  ;;  %v175_v52 = vsel %vm173_vm2, %v2138_v59, %v174_v54  ;;  %v178_v3 = vsel %vm176_vm3, %v177_v23, %v2169_v27  ;;  %v1606_v58 = vld [vmem:[#allocation2 + $0x40] sm:$0xff] }
  0xa7   :  { %vm487_vm12 = vcmp.eq.s32.totalorder %v2154_v11, 2  ;;  %v1247_v16 = vadd.s32 %v1246_v21, %v1242_v6  ;;  %v2293_v28 = vsel %vm170_vm4, nan, %v283_v22  ;;  %vm586_vm13 = vcmp.lt.s32.totalorder %v2265_v10, 2 }
  0xa8   :  { %v853_v24 = vand.u32 2147483647, %v852_v43  ;;  %v855_v14 = vcvt.s32.f32 %v848_v7  ;;  %v386_v54 = vsel %vm379_vm5, %v382_v12, %v385_v19  ;;  %vm587_vm14 = vcmp.eq.s32.totalorder %v2265_v10, 0  ;;  %v763_v12 = vld [vmem:[#allocation4 + $0x28] sm:$0xff] }
  0xa9   :  { %vm590_vm15 = vcmp.eq.s32.totalorder %v2265_v10, 2  ;;  %v1248_v59 = vadd.s32 536870912, %v1247_v16  ;;  %v179_v23 = vsel %vm172_vm7, %v175_v52, %v178_v3  ;;  %vm690_vm0 = vcmp.lt.s32.totalorder %v2268_v25, 2 }
  0xaa   :  { %v1055_v27 = vor.u32 %v1054_v15, %v1053_v48  ;;  %v1059_v4 = vor.u32 4788187, %v1058_v56  ;;  %v486_v62 = vsel %vm484_vm8, %v1583_v53, %v381_v9  ;;  %v489_v41 = vsel %vm487_vm12, %v384_v55, %v1585_v31 }
  0xab   :  { %v704_v61 = vsub.f32 0.0, %v2293_v28  ;;  %v2306_v44 = vshrl.u32 %v1248_v59, 30  ;;  %v2310_v5 = vsel %vm377_vm9, nan, %v386_v54  ;;  %v588_v18 = vxor.u32 2147483648, %v1589_v29 }
  0xac   :  { %v591_v40 = vxor.u32 2147483648, %v2259_v20  ;;  %v856_v39 = vmul.f32 %v855_v14, %v853_v24  ;;  %v2315_v38 = vsel %vm170_vm4, nan, %v179_v23  ;;  %vm691_vm1 = vcmp.eq.s32.totalorder %v2268_v25, 0 }
  0xad   :  { %vm694_vm2 = vcmp.eq.s32.totalorder %v2268_v25, 2  ;;  %v1250_v53 = vshll.u32 %v2306_v44, 30  ;;  %v490_v31 = vsel %vm483_vm11, %v486_v62, %v489_v41  ;;  %v859_v37 = vsub.s32 4, %v2015_v50 }
  0xae   :  { %v1060_v51 = vand.u32 2147483647, %v1059_v4  ;;  %v1062_v34 = vcvt.s32.f32 %v1055_v27  ;;  %v592_v63 = vsel %vm590_vm15, %v591_v40, %v1589_v29  ;;  %v705_v0 = vmul.f32 %v704_v61, %v2310_v5 }
  0xaf   :  { %v712_v33 = vmul.f32 %v2310_v5, %v2315_v38  ;;  %v2328_v17 = vsub.s32 %v1247_v16, %v1250_v53  ;;  %v589_v11 = vsel %vm587_vm14, %v2259_v20, %v588_v18  ;;  %v693_v9 = vsel %vm691_vm1, %v2259_v20, %v588_v18 }
  0xb0   :  { %v696_v55 = vsel %vm694_vm2, %v591_v40, %v1589_v29  ;;  %v857_v6 = vxor.u32 2147483648, %v856_v39  ;;  %vm584_vm3 = vweird.f32 %v1606_v58  ;;  %v2334_v7 = vmul.f32 0.5, %v759_v13 }
  0xb1   :  { %vm775_vm4 = vcmp.lt.s32.totalorder %v1830_v49, 0  ;;  %v1253_v43 = vsub.s32 0, %v2328_v17  ;;  %v2340_v22 = vsel %vm377_vm9, nan, %v490_v31  ;;  %v2342_v19 = vmul.f32 0.5, %v761_v47 }
  0xb2   :  { %v860_v48 = vsel %vm775_vm4, %v859_v37, %v2015_v50  ;;  %v1063_v20 = vmul.f32 %v1062_v34, %v1060_v51  ;;  %v593_v29 = vsel %vm586_vm13, %v589_v11, %v592_v63  ;;  %v697_v15 = vsel %vm690_vm0, %v693_v9, %v696_v55 }
  0xb3   :  { %v737_v56 = vmul.f32 %v2340_v22, %v2010_v35  ;;  %v1537_v21 = vmin.u32 %v1253_v43, %v2328_v17  ;;  %v721_v1 = vmul.f32 %v705_v0, %v2010_v35  ;;  %v2354_v52 = vmul.f32 %v712_v33, %v2010_v35 }
  0xb4   :  { %v2543_v3 = vand.u32 2147483647, %v1830_v49  ;;  %v858_v50 = vsel %vm775_vm4, %v857_v6, %v856_v39  ;;  %v2358_v16 = vmul.f32 0.5, %v763_v12  ;;  %vm2362_vm6 = vcmp.le.f32.partialorder %v980_v60, 0.7853982 }
  0xb5   :  { %v1255_v24 = vclz %v1537_v21  ;;  %v594_v14 = vsel %vm584_vm3, nan, %v593_v29  ;;  %v698_v54 = vsel %vm584_vm3, nan, %v697_v15  ;;  %vm982_vm7 = vcmp.lt.s32.totalorder %v1960_v32, 0 }
  0xb6   :  { %vm774_vm5 = vcmp.le.f32.partialorder %v2543_v3, 0.7853982  ;;  %v1064_v35 = vxor.u32 2147483648, %v1063_v20  ;;  %v716_v59 = vsub.f32 0.0, %v2310_v5  ;;  %v2371_v23 = vmul.f32 %v737_v56, %v2340_v22 }
  0xb7   :  { %v862_v10 = vsel %vm774_vm5, 0, %v860_v48  ;;  %v861_v27 = vsel %vm774_vm5, %v1830_v49, %v858_v50  ;;  %v1538_v4 = vadd.s32 4294967294, %v1255_v24  ;;  %v2374_v60 = vmul.f32 %v721_v1, %v705_v0 }
  0xb8   :  { %v2377_v62 = vmul.f32 %v2354_v52, %v712_v33  ;;  %v2379_v41 = vmul.f32 %v721_v1, %v712_v33  ;;  %v969_v61 = vadd.s32 3, %v862_v10  ;;  %v699_v18 = vmul.f32 %v698_v54, %v2340_v22 }
  0xb9   :  { %v700_v40 = vmul.f32 %v594_v14, %v2340_v22  ;;  %v1243_v39 = vadd.s32 %v2237_v46, %v2250_v36  ;;  %vm1539_vm8 = vcmp.lt.s32.totalorder %v1538_v4, 0  ;;  %v701_v53 = vmul.f32 %v594_v14, %v2315_v38 }
  0xba   :  { %1590 = vcosq.f32 %v861_v27  ;;  %v1065_v49 = vsel %vm982_vm7, %v1064_v35, %v1063_v20  ;;  %v1258_v31 = vsel %vm1539_vm8, 0, %v1538_v4  ;;  %v706_v34 = vmul.f32 %v698_v54, %v2315_v38 }
  0xbb   :  { %1592 = vsinq.f32 %v861_v27  ;;  %v1259_v13 = vsub.s32 32, %v1258_v31  ;;  %v1260_v37 = vshll.u32 %v2328_v17, %v1258_v31  ;;  %v1263_v51 = vsub.s32 4294967266, %v1258_v31 }
  0xbc   :  { %v709_v63 = vmul.f32 %v594_v14, %v2293_v28  ;;  %v713_v0 = vmul.f32 %v698_v54, %v2293_v28  ;;  %v2392_v46 = vmul.f32 %v716_v59, %v698_v54  ;;  %v2395_v36 = vmul.f32 %v594_v14, %v2310_v5 }
  0xbd   :  { %v1068_v33 = vsel %vm2362_vm6, %v1960_v32, %v1065_v49  ;;  %v1261_v47 = vshrl.u32 %v1243_v39, %v1259_v13  ;;  %v1264_v11 = vadd.s32 127, %v1263_v51  ;;  %v702_v17 = vmul.f32 %v699_v18, %v2293_v28  ;;  %v1607_v39 = vld [vmem:[#allocation4 + $0x30] sm:$0xff] }
  0xbe   :  { %v710_v9 = vmul.f32 %v699_v18, %v2315_v38  ;;  %v714_v55 = vmul.f32 %v700_v40, %v2315_v38  ;;  %v1066_v6 = vsub.s32 4, %v2159_v26  ;;  %v707_v58 = vmul.f32 %v700_v40, %v2293_v28 }
  0xbf   :  { %v735_v5 = vmul.f32 %v2392_v46, %v2008_v57  ;;  %vm2409_vm9 = vcmp.le.f32.partialorder %v1187_v8, 0.7853982  ;;  %v1262_v12 = vor.u32 %v1261_v47, %v1260_v37  ;;  %v1265_v48 = vshll.u32 %v1264_v11, 23 }
  0xc0   :  { %v2414_v20 = vmul.f32 %v721_v1, %v2340_v22  ;;  %v2416_v29 = vand.u32 3, %v862_v10  ;;  %v2418_v38 = vand.u32 3, %v969_v61  ;;  %1594 = vcosq.f32 %v1068_v33 }
  0xc1   :  { %v740_v28 = vmul.f32 %v2395_v36, %v2012_v45  ;;  %1596 = vsinq.f32 %v1068_v33  ;;  %v1266_v15 = vor.u32 4788187, %v1265_v48  ;;  %v1269_v56 = vcvt.s32.f32 %v1262_v12 }
  0xc2   :  { %v703_v8 = vsub.f32 %v701_v53, %v702_v17  ;;  %v711_v21 = vadd.f32 %v710_v9, %v709_v63  ;;  %v715_v3 = vsub.f32 %v713_v0, %v714_v55  ;;  %v1067_v50 = vsel %vm982_vm7, %v1066_v6, %v2159_v26 }
  0xc3   :  { %v708_v1 = vadd.f32 %v707_v58, %v706_v34  ;;  %v736_v10 = vmul.f32 %v735_v5, %v2392_v46  ;;  %v1267_v24 = vand.u32 2147483647, %v1266_v15  ;;  %v1273_v14 = vsub.s32 4, %v2306_v44 }
  0xc4   :  { %v1591_v54 = vpop.eup %1590  ;;  %v2429_v35 = vmul.f32 %v2354_v52, %v2340_v22  ;;  %vm868_vm11 = vcmp.eq.s32.totalorder %v2416_v29, 0  ;;  %vm871_vm10 = vcmp.eq.s32.totalorder %v2416_v29, 2  ;;  %vm1189_vm12 = vcmp.lt.s32.totalorder %v2048_v30, 0 }
  0xc5   :  { %v1593_v59 = vpop.eup %1592  ;;  %vm971_vm13 = vcmp.lt.s32.totalorder %v2418_v38, 2  ;;  %vm972_vm14 = vcmp.eq.s32.totalorder %v2418_v38, 0  ;;  %v1069_v26 = vsel %vm2362_vm6, 0, %v1067_v50  ;;  %v1270_v27 = vmul.f32 %v1269_v56, %v1267_v24 }
  0xc6   :  { %v719_v4 = vmul.f32 %v703_v8, %v2008_v57  ;;  %v727_v22 = vmul.f32 %v711_v21, %v2008_v57  ;;  %v732_v52 = vmul.f32 %v715_v3, %v2012_v45  ;;  %v741_v61 = vmul.f32 %v740_v28, %v2395_v36 }
  0xc7   :  { %vm867_vm15 = vcmp.lt.s32.totalorder %v2416_v29, 2  ;;  %v724_v18 = vmul.f32 %v708_v1, %v2012_v45  ;;  %v739_v40 = vadd.f32 %v2371_v23, %v736_v10  ;;  %vm865_vm0 = vweird.f32 %v1607_v39 }
  0xc8   :  { %v1271_v53 = vxor.u32 2147483648, %v1270_v27  ;;  %v1274_v25 = vsel %vm1189_vm12, %v1273_v14, %v2306_v44  ;;  %v869_v49 = vxor.u32 2147483648, %v1593_v59  ;;  %v872_v31 = vxor.u32 2147483648, %v1591_v54 }
  0xc9   :  { %vm975_vm1 = vcmp.eq.s32.totalorder %v2418_v38, 2  ;;  %v1176_v57 = vadd.s32 3, %v1069_v26  ;;  %v720_v13 = vmul.f32 %v719_v4, %v703_v8  ;;  %v725_v37 = vmul.f32 %v724_v18, %v708_v1 }
  0xca   :  { %v1073_v51 = vand.u32 3, %v1069_v26  ;;  %v1272_v45 = vsel %vm1189_vm12, %v1271_v53, %v1270_v27  ;;  %v1595_v34 = vpop.eup %1594  ;;  %v728_v23 = vmul.f32 %v727_v22, %v711_v21  ;;  %v733_v63 = vmul.f32 %v732_v52, %v715_v3 }
  0xcb   :  { %v1275_v0 = vsel %vm2409_vm9, %v2048_v30, %v1272_v45  ;;  %v1276_v44 = vsel %vm2409_vm9, 0, %v1274_v25  ;;  %v1597_v33 = vpop.eup %1596  ;;  %v2456_v47 = vadd.f32 %v741_v61, %v739_v40  ;;  %v743_v11 = vmul.f32 %v719_v4, %v711_v21 }
  0xcc   :  { %v746_v17 = vmul.f32 %v724_v18, %v715_v3  ;;  %1598 = vcosq.f32 %v1275_v0  ;;  %v974_v9 = vsel %vm972_vm14, %v1591_v54, %v869_v49  ;;  %v977_v55 = vsel %vm975_vm1, %v872_v31, %v1593_v59 }
  0xcd   :  { %v1177_v6 = vand.u32 3, %v1176_v57  ;;  %1600 = vsinq.f32 %v1275_v0  ;;  %v748_v58 = vmul.f32 %v719_v4, %v2392_v46  ;;  %vm1072_vm2 = vweird.f32 %v1960_v32 }
  0xce   :  { %vm1075_vm3 = vcmp.eq.s32.totalorder %v1073_v51, 0  ;;  %vm1078_vm4 = vcmp.eq.s32.totalorder %v1073_v51, 2  ;;  %v1383_v5 = vadd.s32 3, %v1276_v44  ;;  %v870_v43 = vsel %vm868_vm11, %v1591_v54, %v869_v49 }
  0xcf   :  { %v873_v12 = vsel %vm871_vm10, %v872_v31, %v1593_v59  ;;  %v1076_v48 = vxor.u32 2147483648, %v1597_v33  ;;  %v1079_v28 = vxor.u32 2147483648, %v1595_v34  ;;  %v723_v15 = vadd.f32 %v2374_v60, %v720_v13 }
  0xd0   :  { %v731_v56 = vadd.f32 %v2377_v62, %v728_v23  ;;  %v978_v8 = vsel %vm971_vm13, %v974_v9, %v977_v55  ;;  %vm1074_vm5 = vcmp.lt.s32.totalorder %v1073_v51, 2  ;;  %vm1179_vm6 = vcmp.eq.s32.totalorder %v1177_v6, 0 }
  0xd1   :  { %v1077_v21 = vsel %vm1075_vm3, %v1595_v34, %v1076_v48  ;;  %v1080_v3 = vsel %vm1078_vm4, %v1079_v28, %v1597_v33  ;;  %vm1182_vm7 = vcmp.eq.s32.totalorder %v1177_v6, 2  ;;  %v2473_v50 = vmul.f32 %v724_v18, %v2395_v36 }
  0xd2   :  { %v874_v1 = vsel %vm867_vm15, %v870_v43, %v873_v12  ;;  %v1280_v10 = vand.u32 3, %v1276_v44  ;;  %v1384_v24 = vand.u32 3, %v1383_v5  ;;  %v745_v60 = vadd.f32 %v2379_v41, %v743_v11 }
  0xd3   :  { %v2479_v62 = vadd.f32 %v2414_v20, %v748_v58  ;;  %v753_v38 = vmul.f32 %v727_v22, %v2392_v46  ;;  %v979_v14 = vsel %vm865_vm0, nan, %v978_v8  ;;  %v1081_v54 = vsel %vm1074_vm5, %v1077_v21, %v1080_v3 }
  0xd4   :  { %vm1178_vm8 = vcmp.lt.s32.totalorder %v1177_v6, 2  ;;  %v1181_v59 = vsel %vm1179_vm6, %v1595_v34, %v1076_v48  ;;  %v1184_v26 = vsel %vm1182_vm7, %v1079_v28, %v1597_v33  ;;  %v2483_v27 = vadd.f32 %v725_v37, %v723_v15 }
  0xd5   :  { %v2485_v4 = vadd.f32 %v733_v63, %v731_v56  ;;  %v2488_v29 = vmul.f32 %v732_v52, %v2395_v36  ;;  %v875_v41 = vsel %vm865_vm0, nan, %v874_v1  ;;  %vm1282_vm9 = vcmp.eq.s32.totalorder %v1280_v10, 0 }
  0xd6   :  { %v1599_v61 = vpop.eup %1598  ;;  %vm1285_vm11 = vcmp.eq.s32.totalorder %v1280_v10, 2  ;;  %vm1389_vm10 = vcmp.eq.s32.totalorder %v1384_v24, 2  ;;  %v1399_v46 = vsub.f32 0.0, %v979_v14  ;;  %v1082_v22 = vsel %vm1072_vm2, nan, %v1081_v54 }
  0xd7   :  { %v1601_v20 = vpop.eup %1600  ;;  %v1185_v18 = vsel %vm1178_vm8, %v1181_v59, %v1184_v26  ;;  %v1286_v40 = vxor.u32 2147483648, %v1599_v61  ;;  %vm1386_vm12 = vcmp.eq.s32.totalorder %v1384_v24, 0  ;;  %vm1281_vm13 = vcmp.lt.s32.totalorder %v1280_v10, 2 }
  0xd8   :  { %v1283_v53 = vxor.u32 2147483648, %v1601_v20  ;;  %vm1385_vm14 = vcmp.lt.s32.totalorder %v1384_v24, 2  ;;  %v1407_v25 = vmul.f32 %v1082_v22, %v875_v41  ;;  %v2494_v36 = vadd.f32 %v2429_v35, %v753_v38 }
  0xd9   :  { %vm1279_vm15 = vweird.f32 %v2048_v30  ;;  %v1287_v52 = vsel %vm1285_vm11, %v1286_v40, %v1601_v20  ;;  %v1391_v39 = vsel %vm1389_vm10, %v1286_v40, %v1601_v20  ;;  %v1186_v49 = vsel %vm1072_vm2, nan, %v1185_v18 }
  0xda   :  { %v1284_v31 = vsel %vm1282_vm9, %v1599_v61, %v1283_v53  ;;  %v1388_v57 = vsel %vm1386_vm12, %v1599_v61, %v1283_v53  ;;  %v1411_v13 = vsub.f32 0.0, %v1082_v22  ;;  %v2500_v37 = vadd.f32 %v746_v17, %v745_v60 }
  0xdb   :  { %v1288_v51 = vsel %vm1281_vm13, %v1284_v31, %v1287_v52  ;;  %v1392_v45 = vsel %vm1385_vm14, %v1388_v57, %v1391_v39  ;;  %v1400_v34 = vmul.f32 %v1399_v46, %v1082_v22  ;;  %v1424_v35 = vmul.f32 %v1407_v25, %v2342_v19 }
  0xdc   :  { %v1289_v23 = vsel %vm1279_vm15, nan, %v1288_v51  ;;  %v1393_v63 = vsel %vm1279_vm15, nan, %v1392_v45  ;;  %v1432_v30 = vmul.f32 %v1186_v49, %v2342_v19  ;;  %vm1488_vm1 = vcmask 7168  }
  0xdd   :  { %v1394_v0 = vmul.f32 %v1393_v63, %v1186_v49  ;;  %v1395_v44 = vmul.f32 %v1289_v23, %v1186_v49  ;;  %v1396_v33 = vmul.f32 %v1289_v23, %v875_v41  ;;  %v1401_v32 = vmul.f32 %v1393_v63, %v875_v41 }
  0xde   :  { %v1404_v11 = vmul.f32 %v1289_v23, %v979_v14  ;;  %v1408_v9 = vmul.f32 %v1393_v63, %v979_v14  ;;  %v1412_v55 = vmul.f32 %v1411_v13, %v1393_v63  ;;  %v1413_v6 = vmul.f32 %v1289_v23, %v1082_v22 }
  0xdf   :  { %v1397_v58 = vmul.f32 %v1394_v0, %v979_v14  ;;  %v1402_v17 = vmul.f32 %v1395_v44, %v979_v14  ;;  %v1405_v5 = vmul.f32 %v1394_v0, %v875_v41  ;;  %v1409_v43 = vmul.f32 %v1395_v44, %v875_v41 }
  0xe0   :  { %v1416_v12 = vmul.f32 %v1400_v34, %v2342_v19  ;;  %v1430_v48 = vmul.f32 %v1412_v55, %v2334_v7  ;;  %v1433_v28 = vmul.f32 %v1432_v30, %v1186_v49  ;;  %v1435_v15 = vmul.f32 %v1413_v6, %v2358_v16 }
  0xe1   :  { %v1398_v56 = vsub.f32 %v1396_v33, %v1397_v58  ;;  %v1403_v8 = vadd.f32 %v1402_v17, %v1401_v32  ;;  %v1406_v21 = vadd.f32 %v1405_v5, %v1404_v11  ;;  %v1410_v3 = vsub.f32 %v1408_v9, %v1409_v43 }
  0xe2   :  { %v1417_v1 = vmul.f32 %v1416_v12, %v1400_v34  ;;  %v1425_v10 = vmul.f32 %v1424_v35, %v1407_v25  ;;  %v1431_v24 = vmul.f32 %v1430_v48, %v1412_v55  ;;  %v1436_v60 = vmul.f32 %v1435_v15, %v1413_v6 }
  0xe3   :  { %v1414_v38 = vmul.f32 %v1398_v56, %v2334_v7  ;;  %v1419_v14 = vmul.f32 %v1403_v8, %v2358_v16  ;;  %v1422_v54 = vmul.f32 %v1406_v21, %v2334_v7  ;;  %v1427_v19 = vmul.f32 %v1410_v3, %v2358_v16 }
  0xe4   :  { %v1434_v59 = vadd.f32 %v1433_v28, %v1431_v24  ;;  %v1439_v26 = vmul.f32 %v1416_v12, %v1407_v25  ;;  %v1444_v41 = vmul.f32 %v1416_v12, %v1186_v49  ;;  %v1449_v61 = vmul.f32 %v1424_v35, %v1186_v49 }
  0xe5   :  { %v1415_v46 = vmul.f32 %v1414_v38, %v1398_v56  ;;  %v1420_v20 = vmul.f32 %v1419_v14, %v1403_v8  ;;  %v1423_v22 = vmul.f32 %v1422_v54, %v1406_v21  ;;  %v1428_v18 = vmul.f32 %v1427_v19, %v1410_v3 }
  0xe6   :  { %v1437_v40 = vadd.f32 %v1436_v60, %v1434_v59  ;;  %v1438_v53 = vmul.f32 %v1414_v38, %v1406_v21  ;;  %v1441_v52 = vmul.f32 %v1419_v14, %v1410_v3  ;;  %v1443_v39 = vmul.f32 %v1414_v38, %v1412_v55 }
  0xe7   :  { %v1418_v31 = vadd.f32 %v1417_v1, %v1415_v46  ;;  %v1426_v57 = vadd.f32 %v1425_v10, %v1423_v22  ;;  %v1446_v13 = vmul.f32 %v1419_v14, %v1413_v6  ;;  %v1448_v51 = vmul.f32 %v1422_v54, %v1412_v55 }
  0xe8   :  { %v752_v7 = vadd.f32 %v2473_v50, %v2479_v62  ;;  %v1440_v16 = vadd.f32 %v1439_v26, %v1438_v53  ;;  %v1445_v45 = vadd.f32 %v1444_v41, %v1443_v39  ;;  %v1451_v25 = vmul.f32 %v1427_v19, %v1413_v6 }
  0xe9   :  { %v757_v49 = vadd.f32 %v2488_v29, %v2494_v36  ;;  %v1421_v34 = vadd.f32 %v1420_v20, %v1418_v31  ;;  %v1429_v23 = vadd.f32 %v1428_v18, %v1426_v57  ;;  %v1450_v63 = vadd.f32 %v1449_v61, %v1448_v51 }
  0xea   :  { %v1442_v35 = vadd.f32 %v1441_v52, %v1440_v16  ;;  %v1447_v30 = vadd.f32 %v1446_v13, %v1445_v45  ;;  %v1457_v0 = vsub.f32 %v2456_v47, %v1437_v40  ;;  %v62_v50 = vadd.f32 %v2144_v2, %v2140_v42 }
  0xeb   :  { %v1452_v44 = vadd.f32 %v1451_v25, %v1450_v63  ;;  %v1453_v33 = vsub.f32 %v2483_v27, %v1421_v34  ;;  %v1455_v32 = vsub.f32 %v2485_v4, %v1429_v23  ;;  %v39_v28 = vlaneseq }
  0xec   :  { %v1459_v62 = vsub.f32 %v2500_v37, %v1442_v35  ;;  %v1461_v11 = vsub.f32 %v752_v7, %v1447_v30  ;;  %v1458_v55 = vmul.f32 %v1457_v0, %v1457_v0  ;;  %v1476_v43 = vmax.f32 %v62_v50, 1e-07 }
  0xed   :  { %v1454_v9 = vmul.f32 %v1453_v33, %v1453_v33  ;;  %v1456_v29 = vmul.f32 %v1455_v32, %v1455_v32  ;;  %v1463_v36 = vsub.f32 %v757_v49, %v1452_v44  ;;  %v40_v37 = vshrl.u32 %v39_v28, 7 }
  0xee   :  { %v1460_v6 = vmul.f32 %v1459_v62, %v1459_v62  ;;  %v1462_v58 = vmul.f32 %v1461_v11, %v1461_v11  ;;  %1602 = vrsqrt.f32 %v1476_v43  ;;  %v43_v8 = vand.u32 127, %v39_v28 }
  0xef   :  { %v1464_v17 = vmul.f32 %v1463_v36, %v1463_v36  ;;  %v1465_v5 = vadd.f32 %v1456_v29, %v1454_v9  ;;  %v41_v56 = vmul.u32 128, %v40_v37 }
  0xf0   :  { %v1467_v47 = vadd.f32 %v1462_v58, %v1460_v6 }
  0xf1   :  { %v1466_v12 = vadd.f32 %v1465_v5, %v1458_v55  ;;  %v44_v3 = vadd.s32 %v43_v8, %v41_v56 }
  0xf2   :  { %v1468_v27 = vadd.f32 %v1467_v47, %v1464_v17 }
  0xf3   :  { %vm1484_vm0 = vcmp.lt.s32.totalorder %v44_v3, 8 }
  0xf4   :  { %v1469_v48 = vmul.f32 2.0, %v1468_v27 }
  0xf6   :  { %v1470_v4 = vadd.f32 %v1469_v48, %v1466_v12 }
  0xf8   :  { %v1471_v42 = vadd.f32 %v1470_v4, %v62_v50  ;;  %v1603_v15 = vpop.eup %1602 }
  0xf9   :  { %v1478_v21 = vmul.f32 %v1603_v15, %v1476_v43 }
  0xfa   :  { %v1472_v2 = vmax.f32 %v1471_v42, 1e-07 }
  0xfb   :  { %v1479_v1 = vmul.f32 0.8, %v1478_v21 }
  0xfc   :  { %1604 = vrsqrt.f32 %v1472_v2 }
 0x106   :  { %v1605_v10 = vpop.eup %1604 }
 0x107   :  { %v1474_v24 = vmul.f32 %v1605_v10, %v1472_v2 }
 0x109   :  { %v1480_v60 = vadd.f32 %v1479_v1, %v1474_v24 }
 0x10b   :  { %v1485_v38 = vsel %vm1484_vm0, %v1480_v60, 0.0 }
 0x10c   :  { %1486 = vadd.xlane.f32.xlu0 %v1485_v38 }
 0x199   :  { %v1487_v14 = vpop.xlane.xlu0 %1486 }
 0x19a   :  { %1489 = vst.msk [vmem:[%s2526_s2] sm:$0xff] %vm1488_vm1, %v1487_v14 }
 0x19b   :  { %1494 = vsyncpa [#allocation3], 1 }
 0x19c   :  { %1495 = vsyncpa [#allocation5], 1 }

</bundles_post_ra>
